<compile_context>
chip_gen: v7x
topology: tpu7x:2x2x1
jax: 0.10.0
libtpu: 0.0.40
codegen_flags: <defaults>
</compile_context>

<pallas_src>
import math

import jax
import jax.numpy as jnp
import numpy as np
from jax.experimental import pallas as pl
from jax.experimental.pallas import tpu as pltpu


def _layer_norm(x, gamma, beta, eps=1e-5):
    # PyTorch LayerNorm: biased variance over the last dim, eps inside rsqrt.
    mean = jnp.mean(x, axis=-1, keepdims=True)
    var = jnp.mean((x - mean) ** 2, axis=-1, keepdims=True)
    return (x - mean) * jax.lax.rsqrt(var + eps) * gamma + beta


def encoder_layer_kernel(
    # inputs
    src_ref,      # (1, S, D)  full sequence (used only at q == 0 for K/V)
    srcq_ref,     # (1, TQ, D) q tile (residual + Q projection)
    w_kvT_ref,    # (2D, D)   fused [wk; wv]^T
    b_kvT_ref,    # (2D, 1)
    wq_ref,       # (H, D, dk) scaled by 1/sqrt(dk)
    bq_ref,       # (H, 1, dk) scaled
    wo_ref,       # (D, D)
    bo_ref,       # (1, D)
    ln1_g_ref, ln1_b_ref,
    w1_ref, b1_ref, w2_ref, b2_ref,
    ln2_g_ref, ln2_b_ref,
    # outputs
    out_ref,      # (1, TQ, D)
    attn_ref,     # (1, H, TQ, S)
    # scratch (persist across q tiles of one batch element)
    kT_ref,       # (H, dk, S)
    vT_ref,       # (H, dk, S)
):
    H, dk, S = kT_ref.shape
    TQ = srcq_ref.shape[1]
    D = srcq_ref.shape[2]
    cd = w1_ref.dtype          # matmul compute dtype (f32 or bf16)

    # ---- K/V projections: once per batch element, reused for all q tiles ----
    @pl.when(pl.program_id(1) == 0)
    def _compute_kv():
        x_kv = src_ref[0]                                        # (S, D) f32
        # Fused, transposed K/V projection: (2D, D) x (S, D)^T -> (2D, S).
        # Full-D contraction, large N = S -> full MXU utilization, and the
        # result is already head-major transposed (no activation transpose).
        kvT = jnp.einsum('ed,sd->es', w_kvT_ref[...], x_kv.astype(cd),
                         preferred_element_type=jnp.float32) + b_kvT_ref[...]
        # Static per-head sublane slices -> (H, dk, S) scratch (data movement
        # only, once per batch element).
        for h in range(H):
            kT_ref[h] = kvT[h * dk:(h + 1) * dk, :].astype(cd)
            vT_ref[h] = kvT[D + h * dk:D + (h + 1) * dk, :].astype(cd)

    # ---- Q projection for this tile (scale already folded into wq/bq) ----
    x_q = srcq_ref[0]                                            # (TQ, D) f32
    x_q_b = jnp.broadcast_to(x_q.astype(cd)[None], (H, TQ, D))   # small: H*TQ*D
    qh = jnp.einsum('hqd,hdk->hqk', x_q_b, wq_ref[...],
                    preferred_element_type=jnp.float32) + bq_ref[...]  # (H,TQ,dk)

    # ---- scaled dot-product attention (K already transposed in scratch) ----
    scores = jnp.einsum('hqd,hds->hqs', qh.astype(cd), kT_ref[...],
                        preferred_element_type=jnp.float32)      # (H, TQ, S)
    m = jnp.max(scores, axis=-1, keepdims=True)
    p = jnp.exp(scores - m)
    denom = jnp.sum(p, axis=-1, keepdims=True)
    probs = p / denom                                            # exact softmax

    # Single lane-dense store of the attention probabilities for this q-tile.
    attn_ref[0] = probs.astype(attn_ref.dtype)

    # P @ V with V^T resident: (H, dk, S) x (H, TQ, S) -> (H, dk, TQ).
    ahT = jnp.einsum('hds,hqs->hdq', vT_ref[...], probs.astype(cd),
                     preferred_element_type=jnp.float32)

    # ---- output projection: single full-D matmul (no per-head temp/sum) ----
    a_flat = ahT.reshape(D, TQ).T                                # (TQ, D)
    attn_out = jnp.dot(a_flat.astype(cd), wo_ref[...],
                       preferred_element_type=jnp.float32) + bo_ref[...]

    # ---- residual + LayerNorm 1 (dropout == identity) ----
    y = _layer_norm(x_q + attn_out, ln1_g_ref[...], ln1_b_ref[...])

    # ---- position-wise FFN ----
    h1 = jnp.dot(y.astype(cd), w1_ref[...],
                 preferred_element_type=jnp.float32) + b1_ref[...]
    h1 = jnp.maximum(h1, 0.0)
    f = jnp.dot(h1.astype(cd), w2_ref[...],
                preferred_element_type=jnp.float32) + b2_ref[...]

    # ---- residual + LayerNorm 2 ----
    out_ref[0] = _layer_norm(y + f, ln2_g_ref[...],
                             ln2_b_ref[...]).astype(out_ref.dtype)


# --------------------------- host-side wrapper ---------------------------
def _vmem_limit_bytes(S, D, H, dk, block_q, d_ff, weights, cd_bytes, attn_bytes):
    f32 = 4
    acts = 0
    acts += 2 * S * D * f32                        # full-seq src block (x2 buffers)
    acts += 4 * block_q * D * f32                  # q-tile src + out blocks
    acts += 2 * H * block_q * S * attn_bytes       # attn-probs output block
    acts += 2 * H * dk * S * cd_bytes              # K^T / V^T scratch
    acts += 2 * D * S * f32                        # fused KV projection temp
    acts += H * block_q * D * cd_bytes             # broadcast q activations
    acts += H * block_q * max(dk, 128) * f32       # Qh
    acts += 3 * H * block_q * S * f32              # scores / exp / probs temps
    acts += H * dk * max(block_q, 128) * f32       # A^T
    acts += 2 * block_q * max(D, 128) * f32        # A / attention output
    acts += 2 * block_q * d_ff * f32               # FFN hidden
    # Blocked constant-index weight specs are double-buffered by the pipeline.
    w_bytes = 2 * sum(int(np.prod(w.shape)) * w.dtype.itemsize for w in weights)
    est = int(1.3 * (acts + w_bytes))
    try:
        cap = int(pltpu.get_tpu_info().vmem_capacity_bytes)
    except Exception:
        cap = 64 * 1024 * 1024                     # conservative (v7x per-TC VMEM)
    ceiling = int(cap * 0.9)
    return max(min(est, ceiling), 32 * 1024 * 1024)


def encoder_layer(src, params, n_heads, compute_dtype=jnp.float32,
                  block_q=None, attn_dtype=jnp.float32):
    """src: (B, S, D) float32. Returns (out (B,S,D), attn_probs (B,H,S,S))."""
    B, S, D = src.shape
    assert D % n_heads == 0
    H = n_heads
    dk = D // H                        # best MXU/layout behavior when dk % 8 == 0
    d_ff = params["w1"].shape[1]
    scale = 1.0 / math.sqrt(dk)
    cd = compute_dtype

    # Query-tile size (tunable; v6e's 128 MiB VMEM tolerates 256-512).
    if block_q is None:
        block_q = S
        for cand in (256, 128):
            if S > cand and S % cand == 0:
                block_q = cand
                break
    assert S % block_q == 0 and (block_q == S or block_q % 8 == 0)
    num_q = S // block_q

    # ---- host-side weight preparation (free) ----
    w_kvT = jnp.concatenate([params["wk"], params["wv"]], axis=1).T.astype(cd)   # (2D, D)
    b_kvT = jnp.concatenate(
        [params["bk"].reshape(-1), params["bv"].reshape(-1)]
    ).reshape(2 * D, 1).astype(jnp.float32)
    wq_h = (params["wq"] * scale).reshape(D, H, dk).transpose(1, 0, 2).astype(cd)  # (H, D, dk)
    bq_h = (params["bq"].reshape(-1) * scale).reshape(H, dk)[:, None, :].astype(jnp.float32)

    weights = [
        w_kvT, b_kvT, wq_h, bq_h,
        params["wo"].astype(cd), params["bo"].astype(jnp.float32),
        params["ln1_g"].astype(jnp.float32), params["ln1_b"].astype(jnp.float32),
        params["w1"].astype(cd), params["b1"].astype(jnp.float32),
        params["w2"].astype(cd), params["b2"].astype(jnp.float32),
        params["ln2_g"].astype(jnp.float32), params["ln2_b"].astype(jnp.float32),
    ]

    out_shape = (
        jax.ShapeDtypeStruct((B, S, D), jnp.float32),
        jax.ShapeDtypeStruct((B, H, S, S), attn_dtype),
    )
    out_specs = (
        pl.BlockSpec((1, block_q, D), lambda b, q: (b, q, 0)),
        pl.BlockSpec((1, H, block_q, S), lambda b, q: (b, 0, q, 0)),
    )
    src_full_spec = pl.BlockSpec((1, S, D), lambda b, q: (b, 0, 0))
    src_q_spec = pl.BlockSpec((1, block_q, D), lambda b, q: (b, q, 0))

    def _const_map(nd):
        return lambda b, q, _nd=nd: (0,) * _nd

    w_specs = [pl.BlockSpec(w.shape, _const_map(w.ndim)) for w in weights]

    compiler_params = pltpu.CompilerParams(
        # batch axis parallel (megacore sharding); q axis MUST be arbitrary so
        # the K/V scratch computed at q == 0 is valid for all q tiles.
        dimension_semantics=("parallel", "arbitrary"),
        vmem_limit_bytes=_vmem_limit_bytes(
            S, D, H, dk, block_q, d_ff, weights,
            jnp.dtype(cd).itemsize, jnp.dtype(attn_dtype).itemsize),
    )

    return pl.pallas_call(
        encoder_layer_kernel,
        out_shape=out_shape,
        grid=(B, num_q),
        in_specs=[src_full_spec, src_q_spec] + w_specs,
        out_specs=out_specs,
        scratch_shapes=[
            pltpu.VMEM((H, dk, S), cd),   # K^T
            pltpu.VMEM((H, dk, S), cd),   # V^T
        ],
        compiler_params=compiler_params,
    )(src, src, *weights)


# ----------------------- pure-JAX reference for validation -----------------------
def encoder_layer_ref(src, params, n_heads):
    B, S, D = src.shape
    dk = D // n_heads

    def lin(x, w, b):
        return x @ w + b

    Q = lin(src, params["wq"], params["bq"])
    K = lin(src, params["wk"], params["bk"])
    V = lin(src, params["wv"], params["bv"])

    def split(x):  # (B,S,D) -> (B,H,S,dk)
        return x.reshape(B, S, n_heads, dk).transpose(0, 2, 1, 3)

    Qh, Kh, Vh = split(Q), split(K), split(V)
    scores = jnp.einsum("bhqd,bhkd->bhqk", Qh, Kh) / math.sqrt(dk)
    probs = jax.nn.softmax(scores, axis=-1)
    A = jnp.einsum("bhqk,bhkd->bhqd", probs, Vh)
    A = A.transpose(0, 2, 1, 3).reshape(B, S, D)
    attn_out = lin(A, params["wo"], params["bo"])

    def ln(x, g, b, eps=1e-5):
        m = jnp.mean(x, -1, keepdims=True)
        v = jnp.mean((x - m) ** 2, -1, keepdims=True)
        return (x - m) / jnp.sqrt(v + eps) * g + b

    y = ln(src + attn_out, params["ln1_g"], params["ln1_b"])
    h1 = jnp.maximum(lin(y, params["w1"], params["b1"]), 0.0)
    f = lin(h1, params["w2"], params["b2"])
    out = ln(y + f, params["ln2_g"], params["ln2_b"])
    return out, probs


def init_params(key, d_model):
    d_ff = 4 * d_model
    keys = jax.random.split(key, 12)
    s = 0.05

    def w(k, shape):
        return jax.random.normal(k, shape, jnp.float32) * s

    return {
        "wq": w(keys[0], (d_model, d_model)), "bq": w(keys[1], (1, d_model)),
        "wk": w(keys[2], (d_model, d_model)), "bk": w(keys[3], (1, d_model)),
        "wv": w(keys[4], (d_model, d_model)), "bv": w(keys[5], (1, d_model)),
        "wo": w(keys[6], (d_model, d_model)), "bo": w(keys[7], (1, d_model)),
        "ln1_g": jnp.ones((1, d_model), jnp.float32),
        "ln1_b": jnp.zeros((1, d_model), jnp.float32),
        "w1": w(keys[8], (d_model, d_ff)), "b1": w(keys[9], (1, d_ff)),
        "w2": w(keys[10], (d_ff, d_model)), "b2": w(keys[11], (1, d_model)),
        "ln2_g": jnp.ones((1, d_model), jnp.float32),
        "ln2_b": jnp.zeros((1, d_model), jnp.float32),
    }


if __name__ == "__main__":
    B, S, D, H = 2, 8, 32, 4

    key = jax.random.PRNGKey(0)
    k_src, k_par = jax.random.split(key)
    src = jax.random.normal(k_src, (B, S, D), jnp.float32)
    params = init_params(k_par, D)

    out_r, attn_r = encoder_layer_ref(src, params, n_heads=H)

    # f32 compute path: tight check against the reference.
    out, attn = encoder_layer(src, params, n_heads=H, compute_dtype=jnp.float32)
    out = jax.block_until_ready(out)
    attn = jax.block_until_ready(attn)
    np.testing.assert_allclose(np.asarray(out), np.asarray(out_r), rtol=2e-3, atol=2e-3)
    np.testing.assert_allclose(np.asarray(attn), np.asarray(attn_r), rtol=2e-3, atol=2e-3)

    # bf16 matmul path (f32 softmax / LayerNorm statistics): looser tolerance.
    out_bf, attn_bf = encoder_layer(src, params, n_heads=H, compute_dtype=jnp.bfloat16)
    out_bf = jax.block_until_ready(out_bf)
    attn_bf = jax.block_until_ready(attn_bf)
    np.testing.assert_allclose(np.asarray(out_bf), np.asarray(out_r), rtol=2e-2, atol=2e-2)
    np.testing.assert_allclose(np.asarray(attn_bf), np.asarray(attn_r), rtol=2e-2, atol=2e-2)

    print("KERNEL_OK")
</pallas_src>

<mosaic_0001>
module attributes {stable_mosaic.version = 11 : i64} {
  func.func @encoder_layer_kernel(%arg0: i32, %arg1: i32, %arg2: memref<1x8x32xf32, #tpu.memory_space<vmem>>, %arg3: memref<1x8x32xf32, #tpu.memory_space<vmem>>, %arg4: memref<64x32xf32, #tpu.memory_space<vmem>>, %arg5: memref<64x1xf32, #tpu.memory_space<vmem>>, %arg6: memref<4x32x8xf32, #tpu.memory_space<vmem>>, %arg7: memref<4x1x8xf32, #tpu.memory_space<vmem>>, %arg8: memref<32x32xf32, #tpu.memory_space<vmem>>, %arg9: memref<1x32xf32, #tpu.memory_space<vmem>>, %arg10: memref<1x32xf32, #tpu.memory_space<vmem>>, %arg11: memref<1x32xf32, #tpu.memory_space<vmem>>, %arg12: memref<32x128xf32, #tpu.memory_space<vmem>>, %arg13: memref<1x128xf32, #tpu.memory_space<vmem>>, %arg14: memref<128x32xf32, #tpu.memory_space<vmem>>, %arg15: memref<1x32xf32, #tpu.memory_space<vmem>>, %arg16: memref<1x32xf32, #tpu.memory_space<vmem>>, %arg17: memref<1x32xf32, #tpu.memory_space<vmem>>, %arg18: memref<1x8x32xf32, #tpu.memory_space<vmem>>, %arg19: memref<1x4x8x8xf32, #tpu.memory_space<vmem>>, %arg20: memref<4x8x8xf32, #tpu.memory_space<vmem>>, %arg21: memref<4x8x8xf32, #tpu.memory_space<vmem>>) attributes {dimension_semantics = [#tpu.dimension_semantics<parallel>, #tpu.dimension_semantics<arbitrary>], iteration_bounds = array<i64: 2, 1>, scalar_prefetch = 0 : i64, scratch_operands = 2 : i64, tpu.core_type = #tpu.core_type<tc>, window_params = [{transform_indices = @transform_0, window_bounds = array<i64: 1, 8, 32>}, {transform_indices = @transform_1, window_bounds = array<i64: 1, 8, 32>}, {pipeline_mode = #tpu.pipeline_mode<synchronous>, transform_indices = @transform_2, window_bounds = array<i64: 64, 32>}, {pipeline_mode = #tpu.pipeline_mode<synchronous>, transform_indices = @transform_3, window_bounds = array<i64: 64, 1>}, {pipeline_mode = #tpu.pipeline_mode<synchronous>, transform_indices = @transform_4, window_bounds = array<i64: 4, 32, 8>}, {pipeline_mode = #tpu.pipeline_mode<synchronous>, transform_indices = @transform_5, window_bounds = array<i64: 4, 1, 8>}, {pipeline_mode = #tpu.pipeline_mode<synchronous>, transform_indices = @transform_6, window_bounds = array<i64: 32, 32>}, {pipeline_mode = #tpu.pipeline_mode<synchronous>, transform_indices = @transform_7, window_bounds = array<i64: 1, 32>}, {pipeline_mode = #tpu.pipeline_mode<synchronous>, transform_indices = @transform_8, window_bounds = array<i64: 1, 32>}, {pipeline_mode = #tpu.pipeline_mode<synchronous>, transform_indices = @transform_9, window_bounds = array<i64: 1, 32>}, {pipeline_mode = #tpu.pipeline_mode<synchronous>, transform_indices = @transform_10, window_bounds = array<i64: 32, 128>}, {pipeline_mode = #tpu.pipeline_mode<synchronous>, transform_indices = @transform_11, window_bounds = array<i64: 1, 128>}, {pipeline_mode = #tpu.pipeline_mode<synchronous>, transform_indices = @transform_12, window_bounds = array<i64: 128, 32>}, {pipeline_mode = #tpu.pipeline_mode<synchronous>, transform_indices = @transform_13, window_bounds = array<i64: 1, 32>}, {pipeline_mode = #tpu.pipeline_mode<synchronous>, transform_indices = @transform_14, window_bounds = array<i64: 1, 32>}, {pipeline_mode = #tpu.pipeline_mode<synchronous>, transform_indices = @transform_15, window_bounds = array<i64: 1, 32>}, {transform_indices = @transform_16, window_bounds = array<i64: 1, 8, 32>}, {transform_indices = @transform_17, window_bounds = array<i64: 1, 4, 8, 8>}]} {
    %c0_i32 = arith.constant 0 : i32
    %0 = arith.cmpi eq, %arg1, %c0_i32 : i32
    %1 = arith.extui %0 : i1 to i32
    %c0_i32_0 = arith.constant 0 : i32
    %2 = arith.cmpi ne, %1, %c0_i32_0 : i32
    scf.if %2 {
      %c0_60 = arith.constant 0 : index
      %c0_61 = arith.constant 0 : index
      %c0_62 = arith.constant 0 : index
      %101 = vector.load %arg2[%c0_60, %c0_61, %c0_62] : memref<1x8x32xf32, #tpu.memory_space<vmem>>, vector<1x8x32xf32>
      %102 = vector.shape_cast %101 : vector<1x8x32xf32> to vector<8x32xf32>
      %c0_63 = arith.constant 0 : index
      %c0_64 = arith.constant 0 : index
      %103 = vector.load %arg4[%c0_63, %c0_64] : memref<64x32xf32, #tpu.memory_space<vmem>>, vector<64x32xf32>
      "tpu.trace_start"() <{level = 10 : i32, message = "ed,sd->es"}> : () -> ()
      %cst_65 = arith.constant dense<0.000000e+00> : vector<64x8xf32>
      %104 = tpu.matmul %103, %102, %cst_65 {dimension_numbers = #tpu.dot_dimension_numbers<[1], [1], [0], [0], [0, 0, 1, 0], [], []>} : vector<64x32xf32>, vector<8x32xf32>, vector<64x8xf32> -> vector<64x8xf32>
      "tpu.trace_stop"() : () -> ()
      %c0_66 = arith.constant 0 : index
      %c0_67 = arith.constant 0 : index
      %105 = vector.load %arg5[%c0_66, %c0_67] : memref<64x1xf32, #tpu.memory_space<vmem>>, vector<64x1xf32>
      %106 = vector.broadcast %105 : vector<64x1xf32> to vector<64x8xf32>
      %107 = arith.addf %104, %106 : vector<64x8xf32>
      %108 = vector.extract_strided_slice %107 {offsets = [0, 0], sizes = [8, 8], strides = [1, 1]} : vector<64x8xf32> to vector<8x8xf32>
      %c0_68 = arith.constant 0 : index
      %c0_69 = arith.constant 0 : index
      %c0_70 = arith.constant 0 : index
      %109 = vector.load %arg20[%c0_68, %c0_69, %c0_70] : memref<4x8x8xf32, #tpu.memory_space<vmem>>, vector<1x8x8xf32>
      %110 = vector.shape_cast %109 : vector<1x8x8xf32> to vector<8x8xf32>
      %111 = vector.shape_cast %108 : vector<8x8xf32> to vector<1x8x8xf32>
      tpu.vector_store %arg20[%c0_68, %c0_69, %c0_70], %111 {strides = array<i32>} : memref<4x8x8xf32, #tpu.memory_space<vmem>>, vector<1x8x8xf32>,
      %112 = vector.extract_strided_slice %107 {offsets = [32, 0], sizes = [8, 8], strides = [1, 1]} : vector<64x8xf32> to vector<8x8xf32>
      %c0_71 = arith.constant 0 : index
      %c0_72 = arith.constant 0 : index
      %c0_73 = arith.constant 0 : index
      %113 = vector.load %arg21[%c0_71, %c0_72, %c0_73] : memref<4x8x8xf32, #tpu.memory_space<vmem>>, vector<1x8x8xf32>
      %114 = vector.shape_cast %113 : vector<1x8x8xf32> to vector<8x8xf32>
      %115 = vector.shape_cast %112 : vector<8x8xf32> to vector<1x8x8xf32>
      tpu.vector_store %arg21[%c0_71, %c0_72, %c0_73], %115 {strides = array<i32>} : memref<4x8x8xf32, #tpu.memory_space<vmem>>, vector<1x8x8xf32>,
      %116 = vector.extract_strided_slice %107 {offsets = [8, 0], sizes = [8, 8], strides = [1, 1]} : vector<64x8xf32> to vector<8x8xf32>
      %c1 = arith.constant 1 : index
      %c0_74 = arith.constant 0 : index
      %c0_75 = arith.constant 0 : index
      %117 = vector.load %arg20[%c1, %c0_74, %c0_75] : memref<4x8x8xf32, #tpu.memory_space<vmem>>, vector<1x8x8xf32>
      %118 = vector.shape_cast %117 : vector<1x8x8xf32> to vector<8x8xf32>
      %119 = vector.shape_cast %116 : vector<8x8xf32> to vector<1x8x8xf32>
      tpu.vector_store %arg20[%c1, %c0_74, %c0_75], %119 {strides = array<i32>} : memref<4x8x8xf32, #tpu.memory_space<vmem>>, vector<1x8x8xf32>,
      %120 = vector.extract_strided_slice %107 {offsets = [40, 0], sizes = [8, 8], strides = [1, 1]} : vector<64x8xf32> to vector<8x8xf32>
      %c1_76 = arith.constant 1 : index
      %c0_77 = arith.constant 0 : index
      %c0_78 = arith.constant 0 : index
      %121 = vector.load %arg21[%c1_76, %c0_77, %c0_78] : memref<4x8x8xf32, #tpu.memory_space<vmem>>, vector<1x8x8xf32>
      %122 = vector.shape_cast %121 : vector<1x8x8xf32> to vector<8x8xf32>
      %123 = vector.shape_cast %120 : vector<8x8xf32> to vector<1x8x8xf32>
      tpu.vector_store %arg21[%c1_76, %c0_77, %c0_78], %123 {strides = array<i32>} : memref<4x8x8xf32, #tpu.memory_space<vmem>>, vector<1x8x8xf32>,
      %124 = vector.extract_strided_slice %107 {offsets = [16, 0], sizes = [8, 8], strides = [1, 1]} : vector<64x8xf32> to vector<8x8xf32>
      %c2 = arith.constant 2 : index
      %c0_79 = arith.constant 0 : index
      %c0_80 = arith.constant 0 : index
      %125 = vector.load %arg20[%c2, %c0_79, %c0_80] : memref<4x8x8xf32, #tpu.memory_space<vmem>>, vector<1x8x8xf32>
      %126 = vector.shape_cast %125 : vector<1x8x8xf32> to vector<8x8xf32>
      %127 = vector.shape_cast %124 : vector<8x8xf32> to vector<1x8x8xf32>
      tpu.vector_store %arg20[%c2, %c0_79, %c0_80], %127 {strides = array<i32>} : memref<4x8x8xf32, #tpu.memory_space<vmem>>, vector<1x8x8xf32>,
      %128 = vector.extract_strided_slice %107 {offsets = [48, 0], sizes = [8, 8], strides = [1, 1]} : vector<64x8xf32> to vector<8x8xf32>
      %c2_81 = arith.constant 2 : index
      %c0_82 = arith.constant 0 : index
      %c0_83 = arith.constant 0 : index
      %129 = vector.load %arg21[%c2_81, %c0_82, %c0_83] : memref<4x8x8xf32, #tpu.memory_space<vmem>>, vector<1x8x8xf32>
      %130 = vector.shape_cast %129 : vector<1x8x8xf32> to vector<8x8xf32>
      %131 = vector.shape_cast %128 : vector<8x8xf32> to vector<1x8x8xf32>
      tpu.vector_store %arg21[%c2_81, %c0_82, %c0_83], %131 {strides = array<i32>} : memref<4x8x8xf32, #tpu.memory_space<vmem>>, vector<1x8x8xf32>,
      %132 = vector.extract_strided_slice %107 {offsets = [24, 0], sizes = [8, 8], strides = [1, 1]} : vector<64x8xf32> to vector<8x8xf32>
      %c3 = arith.constant 3 : index
      %c0_84 = arith.constant 0 : index
      %c0_85 = arith.constant 0 : index
      %133 = vector.load %arg20[%c3, %c0_84, %c0_85] : memref<4x8x8xf32, #tpu.memory_space<vmem>>, vector<1x8x8xf32>
      %134 = vector.shape_cast %133 : vector<1x8x8xf32> to vector<8x8xf32>
      %135 = vector.shape_cast %132 : vector<8x8xf32> to vector<1x8x8xf32>
      tpu.vector_store %arg20[%c3, %c0_84, %c0_85], %135 {strides = array<i32>} : memref<4x8x8xf32, #tpu.memory_space<vmem>>, vector<1x8x8xf32>,
      %136 = vector.extract_strided_slice %107 {offsets = [56, 0], sizes = [8, 8], strides = [1, 1]} : vector<64x8xf32> to vector<8x8xf32>
      %c3_86 = arith.constant 3 : index
      %c0_87 = arith.constant 0 : index
      %c0_88 = arith.constant 0 : index
      %137 = vector.load %arg21[%c3_86, %c0_87, %c0_88] : memref<4x8x8xf32, #tpu.memory_space<vmem>>, vector<1x8x8xf32>
      %138 = vector.shape_cast %137 : vector<1x8x8xf32> to vector<8x8xf32>
      %139 = vector.shape_cast %136 : vector<8x8xf32> to vector<1x8x8xf32>
      tpu.vector_store %arg21[%c3_86, %c0_87, %c0_88], %139 {strides = array<i32>} : memref<4x8x8xf32, #tpu.memory_space<vmem>>, vector<1x8x8xf32>,
    } else {
    }
    %c0 = arith.constant 0 : index
    %c0_1 = arith.constant 0 : index
    %c0_2 = arith.constant 0 : index
    %3 = vector.load %arg3[%c0, %c0_1, %c0_2] : memref<1x8x32xf32, #tpu.memory_space<vmem>>, vector<1x8x32xf32>
    %4 = vector.shape_cast %3 : vector<1x8x32xf32> to vector<8x32xf32>
    %5 = vector.shape_cast %4 : vector<8x32xf32> to vector<1x8x32xf32>
    %6 = vector.shape_cast %5 : vector<1x8x32xf32> to vector<1x8x32xf32>
    %7 = vector.broadcast %6 : vector<1x8x32xf32> to vector<4x8x32xf32>
    %c0_3 = arith.constant 0 : index
    %c0_4 = arith.constant 0 : index
    %c0_5 = arith.constant 0 : index
    %8 = vector.load %arg6[%c0_3, %c0_4, %c0_5] : memref<4x32x8xf32, #tpu.memory_space<vmem>>, vector<4x32x8xf32>
    "tpu.trace_start"() <{level = 10 : i32, message = "hqd,hdk->hqk"}> : () -> ()
    %cst = arith.constant dense<0.000000e+00> : vector<4x8x8xf32>
    %9 = tpu.matmul %7, %8, %cst {dimension_numbers = #tpu.dot_dimension_numbers<[2], [1], [1], [2], [0, 0, 0, 1, 1, 2], [0], [0]>} : vector<4x8x32xf32>, vector<4x32x8xf32>, vector<4x8x8xf32> -> vector<4x8x8xf32>
    "tpu.trace_stop"() : () -> ()
    %c0_6 = arith.constant 0 : index
    %c0_7 = arith.constant 0 : index
    %c0_8 = arith.constant 0 : index
    %10 = vector.load %arg7[%c0_6, %c0_7, %c0_8] : memref<4x1x8xf32, #tpu.memory_space<vmem>>, vector<4x1x8xf32>
    %11 = vector.broadcast %10 : vector<4x1x8xf32> to vector<4x8x8xf32>
    %12 = arith.addf %9, %11 : vector<4x8x8xf32>
    %c0_9 = arith.constant 0 : index
    %c0_10 = arith.constant 0 : index
    %c0_11 = arith.constant 0 : index
    %13 = vector.load %arg20[%c0_9, %c0_10, %c0_11] : memref<4x8x8xf32, #tpu.memory_space<vmem>>, vector<4x8x8xf32>
    "tpu.trace_start"() <{level = 10 : i32, message = "hqd,hds->hqs"}> : () -> ()
    %cst_12 = arith.constant dense<0.000000e+00> : vector<4x8x8xf32>
    %14 = tpu.matmul %12, %13, %cst_12 {dimension_numbers = #tpu.dot_dimension_numbers<[2], [1], [1], [2], [0, 0, 0, 1, 1, 2], [0], [0]>} : vector<4x8x8xf32>, vector<4x8x8xf32>, vector<4x8x8xf32> -> vector<4x8x8xf32>
    "tpu.trace_stop"() : () -> ()
    %cst_13 = arith.constant dense<0xFF800000> : vector<4x8xf32>
    %15 = vector.multi_reduction <maximumf>, %14, %cst_13 [2] : vector<4x8x8xf32> to vector<4x8xf32>
    %16 = vector.shape_cast %15 : vector<4x8xf32> to vector<4x8x1xf32>
    %17 = vector.broadcast %16 : vector<4x8x1xf32> to vector<4x8x8xf32>
    %18 = arith.subf %14, %17 : vector<4x8x8xf32>
    %19 = math.exp %18 : vector<4x8x8xf32>
    %cst_14 = arith.constant dense<0.000000e+00> : vector<4x8xf32>
    %20 = vector.multi_reduction <add>, %19, %cst_14 [2] : vector<4x8x8xf32> to vector<4x8xf32>
    %21 = vector.shape_cast %20 : vector<4x8xf32> to vector<4x8x1xf32>
    %22 = vector.broadcast %21 : vector<4x8x1xf32> to vector<4x8x8xf32>
    %23 = arith.divf %19, %22 : vector<4x8x8xf32>
    %c0_15 = arith.constant 0 : index
    %c0_16 = arith.constant 0 : index
    %c0_17 = arith.constant 0 : index
    %c0_18 = arith.constant 0 : index
    %24 = vector.load %arg19[%c0_15, %c0_16, %c0_17, %c0_18] : memref<1x4x8x8xf32, #tpu.memory_space<vmem>>, vector<1x4x8x8xf32>
    %25 = vector.shape_cast %24 : vector<1x4x8x8xf32> to vector<4x8x8xf32>
    %26 = vector.shape_cast %23 : vector<4x8x8xf32> to vector<1x4x8x8xf32>
    tpu.vector_store %arg19[%c0_15, %c0_16, %c0_17, %c0_18], %26 {strides = array<i32>} : memref<1x4x8x8xf32, #tpu.memory_space<vmem>>, vector<1x4x8x8xf32>,
    %c0_19 = arith.constant 0 : index
    %c0_20 = arith.constant 0 : index
    %c0_21 = arith.constant 0 : index
    %27 = vector.load %arg21[%c0_19, %c0_20, %c0_21] : memref<4x8x8xf32, #tpu.memory_space<vmem>>, vector<4x8x8xf32>
    "tpu.trace_start"() <{level = 10 : i32, message = "hds,hqs->hdq"}> : () -> ()
    %cst_22 = arith.constant dense<0.000000e+00> : vector<4x8x8xf32>
    %28 = tpu.matmul %27, %23, %cst_22 {dimension_numbers = #tpu.dot_dimension_numbers<[2], [2], [1], [1], [0, 0, 0, 1, 1, 1], [0], [0]>} : vector<4x8x8xf32>, vector<4x8x8xf32>, vector<4x8x8xf32> -> vector<4x8x8xf32>
    "tpu.trace_stop"() : () -> ()
    %29 = vector.shape_cast %28 : vector<4x8x8xf32> to vector<32x8xf32>
    %30 = tpu.transpose %29, [1, 0] : vector<32x8xf32> -> vector<8x32xf32>
    %c0_23 = arith.constant 0 : index
    %c0_24 = arith.constant 0 : index
    %31 = vector.load %arg8[%c0_23, %c0_24] : memref<32x32xf32, #tpu.memory_space<vmem>>, vector<32x32xf32>
    %cst_25 = arith.constant dense<0.000000e+00> : vector<8x32xf32>
    %32 = tpu.matmul %30, %31, %cst_25 {dimension_numbers = #tpu.dot_dimension_numbers<[1], [0], [0], [1], [0, 0, 1, 1], [], []>} : vector<8x32xf32>, vector<32x32xf32>, vector<8x32xf32> -> vector<8x32xf32>
    %c0_26 = arith.constant 0 : index
    %c0_27 = arith.constant 0 : index
    %33 = vector.load %arg9[%c0_26, %c0_27] : memref<1x32xf32, #tpu.memory_space<vmem>>, vector<1x32xf32>
    %34 = vector.broadcast %33 : vector<1x32xf32> to vector<8x32xf32>
    %35 = arith.addf %32, %34 : vector<8x32xf32>
    %36 = arith.addf %4, %35 : vector<8x32xf32>
    %c0_28 = arith.constant 0 : index
    %c0_29 = arith.constant 0 : index
    %37 = vector.load %arg10[%c0_28, %c0_29] : memref<1x32xf32, #tpu.memory_space<vmem>>, vector<1x32xf32>
    %c0_30 = arith.constant 0 : index
    %c0_31 = arith.constant 0 : index
    %38 = vector.load %arg11[%c0_30, %c0_31] : memref<1x32xf32, #tpu.memory_space<vmem>>, vector<1x32xf32>
    %cst_32 = arith.constant dense<0.000000e+00> : vector<8xf32>
    %39 = vector.multi_reduction <add>, %36, %cst_32 [1] : vector<8x32xf32> to vector<8xf32>
    %40 = vector.shape_cast %39 : vector<8xf32> to vector<8x1xf32>
    %cst_33 = arith.constant 3.200000e+01 : f32
    %41 = vector.broadcast %cst_33 : f32 to vector<8x1xf32>
    %42 = arith.divf %40, %41 : vector<8x1xf32>
    %43 = vector.broadcast %42 : vector<8x1xf32> to vector<8x32xf32>
    %44 = arith.subf %36, %43 : vector<8x32xf32>
    %45 = arith.mulf %44, %44 : vector<8x32xf32>
    %cst_34 = arith.constant dense<0.000000e+00> : vector<8xf32>
    %46 = vector.multi_reduction <add>, %45, %cst_34 [1] : vector<8x32xf32> to vector<8xf32>
    %47 = vector.shape_cast %46 : vector<8xf32> to vector<8x1xf32>
    %cst_35 = arith.constant 3.200000e+01 : f32
    %48 = vector.broadcast %cst_35 : f32 to vector<8x1xf32>
    %49 = arith.divf %47, %48 : vector<8x1xf32>
    %50 = vector.broadcast %42 : vector<8x1xf32> to vector<8x32xf32>
    %51 = arith.subf %36, %50 : vector<8x32xf32>
    %cst_36 = arith.constant 9.99999974E-6 : f32
    %52 = vector.broadcast %cst_36 : f32 to vector<8x1xf32>
    %53 = arith.addf %49, %52 : vector<8x1xf32>
    %54 = math.rsqrt %53 : vector<8x1xf32>
    %55 = vector.broadcast %54 : vector<8x1xf32> to vector<8x32xf32>
    %56 = arith.mulf %51, %55 : vector<8x32xf32>
    %57 = vector.broadcast %37 : vector<1x32xf32> to vector<8x32xf32>
    %58 = arith.mulf %56, %57 : vector<8x32xf32>
    %59 = vector.broadcast %38 : vector<1x32xf32> to vector<8x32xf32>
    %60 = arith.addf %58, %59 : vector<8x32xf32>
    %c0_37 = arith.constant 0 : index
    %c0_38 = arith.constant 0 : index
    %61 = vector.load %arg12[%c0_37, %c0_38] : memref<32x128xf32, #tpu.memory_space<vmem>>, vector<32x128xf32>
    %cst_39 = arith.constant dense<0.000000e+00> : vector<8x128xf32>
    %62 = tpu.matmul %60, %61, %cst_39 {dimension_numbers = #tpu.dot_dimension_numbers<[1], [0], [0], [1], [0, 0, 1, 1], [], []>} : vector<8x32xf32>, vector<32x128xf32>, vector<8x128xf32> -> vector<8x128xf32>
    %c0_40 = arith.constant 0 : index
    %c0_41 = arith.constant 0 : index
    %63 = vector.load %arg13[%c0_40, %c0_41] : memref<1x128xf32, #tpu.memory_space<vmem>>, vector<1x128xf32>
    %64 = vector.broadcast %63 : vector<1x128xf32> to vector<8x128xf32>
    %65 = arith.addf %62, %64 : vector<8x128xf32>
    %cst_42 = arith.constant 0.000000e+00 : f32
    %66 = vector.broadcast %cst_42 : f32 to vector<8x128xf32>
    %67 = arith.maximumf %65, %66 : vector<8x128xf32>
    %c0_43 = arith.constant 0 : index
    %c0_44 = arith.constant 0 : index
    %68 = vector.load %arg14[%c0_43, %c0_44] : memref<128x32xf32, #tpu.memory_space<vmem>>, vector<128x32xf32>
    %cst_45 = arith.constant dense<0.000000e+00> : vector<8x32xf32>
    %69 = tpu.matmul %67, %68, %cst_45 {dimension_numbers = #tpu.dot_dimension_numbers<[1], [0], [0], [1], [0, 0, 1, 1], [], []>} : vector<8x128xf32>, vector<128x32xf32>, vector<8x32xf32> -> vector<8x32xf32>
    %c0_46 = arith.constant 0 : index
    %c0_47 = arith.constant 0 : index
    %70 = vector.load %arg15[%c0_46, %c0_47] : memref<1x32xf32, #tpu.memory_space<vmem>>, vector<1x32xf32>
    %71 = vector.broadcast %70 : vector<1x32xf32> to vector<8x32xf32>
    %72 = arith.addf %69, %71 : vector<8x32xf32>
    %73 = arith.addf %60, %72 : vector<8x32xf32>
    %c0_48 = arith.constant 0 : index
    %c0_49 = arith.constant 0 : index
    %74 = vector.load %arg16[%c0_48, %c0_49] : memref<1x32xf32, #tpu.memory_space<vmem>>, vector<1x32xf32>
    %c0_50 = arith.constant 0 : index
    %c0_51 = arith.constant 0 : index
    %75 = vector.load %arg17[%c0_50, %c0_51] : memref<1x32xf32, #tpu.memory_space<vmem>>, vector<1x32xf32>
    %cst_52 = arith.constant dense<0.000000e+00> : vector<8xf32>
    %76 = vector.multi_reduction <add>, %73, %cst_52 [1] : vector<8x32xf32> to vector<8xf32>
    %77 = vector.shape_cast %76 : vector<8xf32> to vector<8x1xf32>
    %cst_53 = arith.constant 3.200000e+01 : f32
    %78 = vector.broadcast %cst_53 : f32 to vector<8x1xf32>
    %79 = arith.divf %77, %78 : vector<8x1xf32>
    %80 = vector.broadcast %79 : vector<8x1xf32> to vector<8x32xf32>
    %81 = arith.subf %73, %80 : vector<8x32xf32>
    %82 = arith.mulf %81, %81 : vector<8x32xf32>
    %cst_54 = arith.constant dense<0.000000e+00> : vector<8xf32>
    %83 = vector.multi_reduction <add>, %82, %cst_54 [1] : vector<8x32xf32> to vector<8xf32>
    %84 = vector.shape_cast %83 : vector<8xf32> to vector<8x1xf32>
    %cst_55 = arith.constant 3.200000e+01 : f32
    %85 = vector.broadcast %cst_55 : f32 to vector<8x1xf32>
    %86 = arith.divf %84, %85 : vector<8x1xf32>
    %87 = vector.broadcast %79 : vector<8x1xf32> to vector<8x32xf32>
    %88 = arith.subf %73, %87 : vector<8x32xf32>
    %cst_56 = arith.constant 9.99999974E-6 : f32
    %89 = vector.broadcast %cst_56 : f32 to vector<8x1xf32>
    %90 = arith.addf %86, %89 : vector<8x1xf32>
    %91 = math.rsqrt %90 : vector<8x1xf32>
    %92 = vector.broadcast %91 : vector<8x1xf32> to vector<8x32xf32>
    %93 = arith.mulf %88, %92 : vector<8x32xf32>
    %94 = vector.broadcast %74 : vector<1x32xf32> to vector<8x32xf32>
    %95 = arith.mulf %93, %94 : vector<8x32xf32>
    %96 = vector.broadcast %75 : vector<1x32xf32> to vector<8x32xf32>
    %97 = arith.addf %95, %96 : vector<8x32xf32>
    %c0_57 = arith.constant 0 : index
    %c0_58 = arith.constant 0 : index
    %c0_59 = arith.constant 0 : index
    %98 = vector.load %arg18[%c0_57, %c0_58, %c0_59] : memref<1x8x32xf32, #tpu.memory_space<vmem>>, vector<1x8x32xf32>
    %99 = vector.shape_cast %98 : vector<1x8x32xf32> to vector<8x32xf32>
    %100 = vector.shape_cast %97 : vector<8x32xf32> to vector<1x8x32xf32>
    tpu.vector_store %arg18[%c0_57, %c0_58, %c0_59], %100 {strides = array<i32>} : memref<1x8x32xf32, #tpu.memory_space<vmem>>, vector<1x8x32xf32>,
    return
  }
  func.func @transform_0(%arg0: i32, %arg1: i32) -> (i32, i32, i32) {
    %c0_i32 = arith.constant 0 : i32
    %c0_i32_0 = arith.constant 0 : i32
    %c0_i32_1 = arith.constant 0 : i32
    return %arg0, %c0_i32, %c0_i32_0 : i32, i32, i32
  }
  func.func @transform_1(%arg0: i32, %arg1: i32) -> (i32, i32, i32) {
    %c0_i32 = arith.constant 0 : i32
    %c0_i32_0 = arith.constant 0 : i32
    return %arg0, %arg1, %c0_i32 : i32, i32, i32
  }
  func.func @transform_2(%arg0: i32, %arg1: i32) -> (i32, i32) {
    %c0_i32 = arith.constant 0 : i32
    %c0_i32_0 = arith.constant 0 : i32
    %c0_i32_1 = arith.constant 0 : i32
    return %c0_i32, %c0_i32_0 : i32, i32
  }
  func.func @transform_3(%arg0: i32, %arg1: i32) -> (i32, i32) {
    %c0_i32 = arith.constant 0 : i32
    %c0_i32_0 = arith.constant 0 : i32
    %c0_i32_1 = arith.constant 0 : i32
    return %c0_i32, %c0_i32_0 : i32, i32
  }
  func.func @transform_4(%arg0: i32, %arg1: i32) -> (i32, i32, i32) {
    %c0_i32 = arith.constant 0 : i32
    %c0_i32_0 = arith.constant 0 : i32
    %c0_i32_1 = arith.constant 0 : i32
    %c0_i32_2 = arith.constant 0 : i32
    return %c0_i32, %c0_i32_0, %c0_i32_1 : i32, i32, i32
  }
  func.func @transform_5(%arg0: i32, %arg1: i32) -> (i32, i32, i32) {
    %c0_i32 = arith.constant 0 : i32
    %c0_i32_0 = arith.constant 0 : i32
    %c0_i32_1 = arith.constant 0 : i32
    %c0_i32_2 = arith.constant 0 : i32
    return %c0_i32, %c0_i32_0, %c0_i32_1 : i32, i32, i32
  }
  func.func @transform_6(%arg0: i32, %arg1: i32) -> (i32, i32) {
    %c0_i32 = arith.constant 0 : i32
    %c0_i32_0 = arith.constant 0 : i32
    %c0_i32_1 = arith.constant 0 : i32
    return %c0_i32, %c0_i32_0 : i32, i32
  }
  func.func @transform_7(%arg0: i32, %arg1: i32) -> (i32, i32) {
    %c0_i32 = arith.constant 0 : i32
    %c0_i32_0 = arith.constant 0 : i32
    %c0_i32_1 = arith.constant 0 : i32
    return %c0_i32, %c0_i32_0 : i32, i32
  }
  func.func @transform_8(%arg0: i32, %arg1: i32) -> (i32, i32) {
    %c0_i32 = arith.constant 0 : i32
    %c0_i32_0 = arith.constant 0 : i32
    %c0_i32_1 = arith.constant 0 : i32
    return %c0_i32, %c0_i32_0 : i32, i32
  }
  func.func @transform_9(%arg0: i32, %arg1: i32) -> (i32, i32) {
    %c0_i32 = arith.constant 0 : i32
    %c0_i32_0 = arith.constant 0 : i32
    %c0_i32_1 = arith.constant 0 : i32
    return %c0_i32, %c0_i32_0 : i32, i32
  }
  func.func @transform_10(%arg0: i32, %arg1: i32) -> (i32, i32) {
    %c0_i32 = arith.constant 0 : i32
    %c0_i32_0 = arith.constant 0 : i32
    %c0_i32_1 = arith.constant 0 : i32
    return %c0_i32, %c0_i32_0 : i32, i32
  }
  func.func @transform_11(%arg0: i32, %arg1: i32) -> (i32, i32) {
    %c0_i32 = arith.constant 0 : i32
    %c0_i32_0 = arith.constant 0 : i32
    %c0_i32_1 = arith.constant 0 : i32
    return %c0_i32, %c0_i32_0 : i32, i32
  }
  func.func @transform_12(%arg0: i32, %arg1: i32) -> (i32, i32) {
    %c0_i32 = arith.constant 0 : i32
    %c0_i32_0 = arith.constant 0 : i32
    %c0_i32_1 = arith.constant 0 : i32
    return %c0_i32, %c0_i32_0 : i32, i32
  }
  func.func @transform_13(%arg0: i32, %arg1: i32) -> (i32, i32) {
    %c0_i32 = arith.constant 0 : i32
    %c0_i32_0 = arith.constant 0 : i32
    %c0_i32_1 = arith.constant 0 : i32
    return %c0_i32, %c0_i32_0 : i32, i32
  }
  func.func @transform_14(%arg0: i32, %arg1: i32) -> (i32, i32) {
    %c0_i32 = arith.constant 0 : i32
    %c0_i32_0 = arith.constant 0 : i32
    %c0_i32_1 = arith.constant 0 : i32
    return %c0_i32, %c0_i32_0 : i32, i32
  }
  func.func @transform_15(%arg0: i32, %arg1: i32) -> (i32, i32) {
    %c0_i32 = arith.constant 0 : i32
    %c0_i32_0 = arith.constant 0 : i32
    %c0_i32_1 = arith.constant 0 : i32
    return %c0_i32, %c0_i32_0 : i32, i32
  }
  func.func @transform_16(%arg0: i32, %arg1: i32) -> (i32, i32, i32) {
    %c0_i32 = arith.constant 0 : i32
    %c0_i32_0 = arith.constant 0 : i32
    return %arg0, %arg1, %c0_i32 : i32, i32, i32
  }
  func.func @transform_17(%arg0: i32, %arg1: i32) -> (i32, i32, i32, i32) {
    %c0_i32 = arith.constant 0 : i32
    %c0_i32_0 = arith.constant 0 : i32
    %c0_i32_1 = arith.constant 0 : i32
    return %arg0, %c0_i32, %arg1, %c0_i32_0 : i32, i32, i32, i32
  }
}

</mosaic_0001>

<bundles_post_ra>
// kernel: tpu_custom_call.1
= control target key start
LH: loop header
LB: loop body
LE: loop exit
PB: predicated region body
PF: predicated region fallthrough
CT: control target
= control target key end

     0   :  { %s3437_s0 = inlined_call_operand.vmem [shape: f32[2,8,32], index: 0, kind: input, shape index: {}]   ;;  %s3438_s1 = inlined_call_operand.vmem [shape: f32[2,8,32], index: 1, kind: input, shape index: {}]   ;;  %s3439_s2 = inlined_call_operand.vmem [shape: f32[64,32], index: 2, kind: input, shape index: {}]   ;;  %s3440_s3 = inlined_call_operand.vmem [shape: f32[64,1], index: 3, kind: input, shape index: {}]   ;;  %s3441_s4 = inlined_call_operand.vmem [shape: f32[4,32,8], index: 4, kind: input, shape index: {}]   ;;  %s3442_s5 = inlined_call_operand.vmem [shape: f32[4,1,8], index: 5, kind: input, shape index: {}]   ;;  %s3443_s6 = inlined_call_operand.vmem [shape: f32[32,32], index: 6, kind: input, shape index: {}]   ;;  %s3444_s7 = inlined_call_operand.vmem [shape: f32[1,32], index: 7, kind: input, shape index: {}]   ;;  %s3445_s8 = inlined_call_operand.vmem [shape: f32[1,32], index: 8, kind: input, shape index: {}]   ;;  %s3446_s9 = inlined_call_operand.vmem [shape: f32[1,32], index: 9, kind: input, shape index: {}]   ;;  %s3447_s10 = inlined_call_operand.vmem [shape: f32[32,128], index: 10, kind: input, shape index: {}]   ;;  %s3448_s11 = inlined_call_operand.vmem [shape: f32[1,128], index: 11, kind: input, shape index: {}]   ;;  %s3449_s12 = inlined_call_operand.vmem [shape: f32[128,32], index: 12, kind: input, shape index: {}]   ;;  %s3450_s13 = inlined_call_operand.vmem [shape: f32[1,32], index: 13, kind: input, shape index: {}]   ;;  %s3451_s14 = inlined_call_operand.vmem [shape: f32[1,32], index: 14, kind: input, shape index: {}]   ;;  %s3452_s15 = inlined_call_operand.vmem [shape: f32[1,32], index: 15, kind: input, shape index: {}]   ;;  %s3453_s16 = inlined_call_operand.hbm [shape: f32[2,8,32], index: 16, kind: output, shape index: {0}]   ;;  %s3454_s17 = inlined_call_operand.hbm [shape: f32[2,4,8,8], index: 17, kind: output, shape index: {1}]  }
   0x1   :  { %3463 = sst [smem:[#allocation17_spill]] %s3437_s0 }
   0x2   :  { %3464 = sst [smem:[#allocation18_spill]] %s3438_s1 }
   0x3   :  { %3465 = sst [smem:[#allocation19_spill]] %s3439_s2 }
   0x4   :  { %3466 = sst [smem:[#allocation20_spill]] %s3452_s15 }
   0x5   :  { %3467 = sst [smem:[#allocation21_spill]] %s3453_s16 }
   0x6   :  { %23 = vsyncpa [#allocation5], 0 }
   0x7   :  { %25 = vsyncpa [#allocation5 + $0x1], 0 }
   0x8   :  { %26 = vsyncpa [#allocation7], 0 }
   0x9   :  { %28 = vsyncpa [#allocation7 + $0x1], 0  ;;  %s2940_s24 = smov 0   ;;  %s2942_s25 = smov 0  }
   0xa   :  { %s2944_s26 = smov 0   ;;  %s2946_s27 = smov 0  }
   0xb   :  { %s2948_s28 = smov 0   ;;  %s2950_s29 = smov 0  }
   0xc LB: > { %3468 = sst [smem:[#allocation10_spill]] %s2820_s24  ;;  %s2300_s0 = sadd.s32 4294967295, %s2840_s29   ;;  %s2840_s29 = sphi %s2950_s29, %s34_s29   ;;  %s2836_s28 = sphi %s2948_s28, %s3489_s28   ;;  %s2832_s27 = sphi %s2946_s27, %s3488_s27   ;;  %s2828_s26 = sphi %s2944_s26, %s3487_s26   ;;  %s2824_s25 = sphi %s2942_s25, %s3491_s25   ;;  %s2820_s24 = sphi %s2940_s24, %s3490_s24  }
   0xd   : > { %3469 = sst [smem:[#allocation11_spill]] %s2828_s26  ;;  %s2301_s30 = sadd.s32 4294967294, %s2840_s29  }
   0xe   : > { %3470 = sst [smem:[#allocation12_spill]] %s2836_s28  ;;  %s46_s18 = sadd.s32 1, %s2836_s28 }
   0xf   : > { %3471 = sst [smem:[#allocation13_spill]] %s2840_s29  ;;  %s403_s19 = sadd.s32 1, %s2828_s26 }
  0x10   : > { %p48_p0 = scmp.ge.s32.totalorder %s46_s18, 2  ;;  %p413_p1 = scmp.ne.s32.totalorder %s2828_s26, %s2824_s25 }
  0x11   : > { %p414_p2 = scmp.eq.s32.totalorder %s2300_s0, 1  ;;  %p419_p3 = scmp.ne.s32.totalorder %s2824_s25, %s2820_s24 }
  0x12   : > { %s3493_s18 = smov (%p48_p0, %s46_s18), 0  ;;  %p420_p5 = scmp.eq.s32.totalorder %s2301_s30, 1 }
  0x13   : > { %3472 = sst [smem:[#allocation14_spill]] %s3493_s18  ;;  %p2980_p4 = por %p414_p2, %p413_p1 }
  0x14   : > { %s398_s20 = ssub.s32 %s2836_s28, %s3493_s18  ;;  %p2304_p6 = scmp.ge.s32.totalorder %s2840_s29, 1 }
  0x15   : > { %p401_p7 = scmp.eq.s32.totalorder %s398_s20, 0  ;;  %p2987_p8 = por %p420_p5, %p419_p3 }
  0x16   : > { %p525_p9 = scmp.lt.s32.totalorder %s2840_s29, 3 }
  0x17   : > { %s3474_s21 = scalar_select %p2987_p8, 1, 0 }
  0x18   : > { %s2993_s22 = scalar_select %p401_p7, %s2828_s26, %s403_s19  }
  0x19   : > { %3475 = sst [smem:[#allocation15_spill]] %s3474_s21  ;;  %p526_p10 = pnand %p2304_p6, %p525_p9 }
  0x1a   : > { %3476 = sst [smem:[#allocation16_spill]] %s2993_s22  ;;  %p588_p11 = scmp.lt.s32.totalorder (!%p526_p10), %s2832_s27, 1  ;;  %vm660_vm0 = vcmask (!%p526_p10), 261120   ;;  %v2842_v1 = vmov (!%p526_p10), 0.0|0.0   ;;  %vm2843_vm1 = vmmov (!%p526_p10), 0   ;;  %v2844_v2 = vmov (!%p526_p10), 0.0  }
  0x1b   : > { %529 = sbr.rel (%p526_p10) target bundleno = 2476 (0x9ac), region = 84  ;;  %s3477_s2 = sld [smem:[#allocation19_spill]] (!%p526_p10)  ;;  %2600 = vmatprep.subr.bf16.mxu1 (!%p526_p10), %v2842_v1  ;;  %2482 = vmatprep.mubr.msk.f32.mxu1 (!%p526_p10), %vm2843_vm1, %v2844_v2  ;;  %v2845_v3 = vmov (!%p526_p10), 0   ;;  %v809_v4 = vld [vmem:[%s3441_s4] sm:$0xff] (!%p526_p10)  ;;  %v810_v5 = vld [vmem:[%s3441_s4 + $0x8] sm:$0xff] (!%p526_p10)  ;;  %v823_v13 = vld [vmem:[%s3441_s4 + $0x70] sm:$0xff] (!%p526_p10) }
  0x1c   : > { %2708 = vset.pattern.permute.xlu0 (!%p526_p10), %v2845_v3  ;;  %2709 = vset.pattern.permute.xlu1 (!%p526_p10), %v2845_v3  ;;  %s3478_s0 = sld [smem:[#allocation17_spill]] (!%p526_p10)  ;;  %v821_v9 = vld [vmem:[%s3441_s4 + $0x60] sm:$0xff] (!%p526_p10)  ;;  %v822_v10 = vld [vmem:[%s3441_s4 + $0x68] sm:$0xff] (!%p526_p10)  ;;  %v2583_v11 = vpack.c.bf16 (!%p526_p10), %v810_v5, %v809_v4  ;;  %v824_v14 = vld [vmem:[%s3441_s4 + $0x78] sm:$0xff] (!%p526_p10)  ;;  %s3479_s20 = sld [smem:[#allocation18_spill]] (!%p526_p10)  ;;  %vm793_vm2 = vcmask (!%p526_p10), 64512  }
  0x1d   : > { %v2601_v12 = vpack.c.bf16 (!%p526_p10), %v822_v10, %v821_v9  ;;  %v612_v15 = vld [vmem:[%s3440_s3] sm:$0xff] (!%p526_p10)  ;;  %v811_v16 = vld [vmem:[%s3441_s4 + $0x10] sm:$0xff] (!%p526_p10)  ;;  %v812_v17 = vld [vmem:[%s3441_s4 + $0x18] sm:$0xff] (!%p526_p10)  ;;  %v2604_v19 = vpack.c.bf16 (!%p526_p10), %v824_v14, %v823_v13  ;;  %s2846_s29 = smov (!%p526_p10), [#allocation6]  }
  0x1e   : > { %622 = vperm.xlu0 (!%p526_p10), %2708, %v612_v15   ;;  %v614_v18 = vld [vmem:[%s3440_s3 + $0x10] sm:$0xff] (!%p526_p10)  ;;  %v613_v20 = vld [vmem:[%s3440_s3 + $0x8] sm:$0xff] (!%p526_p10)  ;;  %v615_v21 = vld [vmem:[%s3440_s3 + $0x18] sm:$0xff] (!%p526_p10)  ;;  %v2586_v23 = vpack.c.bf16 (!%p526_p10), %v812_v17, %v811_v16 }
  0x1f   : > { %2602 = vmatpush3.bf16.msra.mxu1 (!%p526_p10), %v2601_v12  ;;  %632 = vperm.xlu1 (!%p526_p10), %2709, %v614_v18   ;;  %v813_v29 = vld [vmem:[%s3441_s4 + $0x20] sm:$0xff] (!%p526_p10)  ;;  %v814_v30 = vld [vmem:[%s3441_s4 + $0x28] sm:$0xff] (!%p526_p10)  ;;  %v815_v32 = vld [vmem:[%s3441_s4 + $0x30] sm:$0xff] (!%p526_p10) }
  0x20   : > { %2603 = vmatprep.subr.bf16.mxu1 (!%p526_p10), %v2842_v1  ;;  %v2589_v31 = vpack.c.bf16 (!%p526_p10), %v814_v30, %v813_v29  ;;  %v816_v33 = vld [vmem:[%s3441_s4 + $0x38] sm:$0xff] (!%p526_p10)  ;;  %v817_v35 = vld [vmem:[%s3441_s4 + $0x40] sm:$0xff] (!%p526_p10)  ;;  %v818_v36 = vld [vmem:[%s3441_s4 + $0x48] sm:$0xff] (!%p526_p10) }
  0x21   : > { %v604_v0 = vld [vmem:[%s3477_s2] sm:$0xff] (!%p526_p10)  ;;  %v605_v7 = vld [vmem:[%s3477_s2 + $0x8] sm:$0xff] (!%p526_p10)  ;;  %v606_v8 = vld [vmem:[%s3477_s2 + $0x10] sm:$0xff] (!%p526_p10)  ;;  %v2592_v34 = vpack.c.bf16 (!%p526_p10), %v816_v33, %v815_v32  ;;  %v2595_v37 = vpack.c.bf16 (!%p526_p10), %v818_v36, %v817_v35 }
  0x22   : > { %2429 = vmatprep.mubr.msk.f32.mxu0 %vm660_vm0, %v604_v0  ;;  %s3002_s30 = scalar_select %p588_p11, %s2832_s27, 1  ;;  %v607_v22 = vld [vmem:[%s3477_s2 + $0x18] sm:$0xff]  ;;  %v608_v24 = vld [vmem:[%s3477_s2 + $0x20] sm:$0xff]  ;;  %627 = vperm.xlu0 %2708, %v613_v20   ;;  %v609_v26 = vld [vmem:[%s3477_s2 + $0x28] sm:$0xff] }
  0x23   : > { %2605 = vmatpush3.bf16.msra.mxu1 %v2604_v19  ;;  %637 = vperm.xlu1 %2709, %v615_v21   ;;  %v610_v27 = vld [vmem:[%s3477_s2 + $0x30] sm:$0xff]  ;;  %v611_v28 = vld [vmem:[%s3477_s2 + $0x38] sm:$0xff]  ;;  %v2318_v60 = vld [vmem:[%s3442_s5] ss:$0 sm:$0xff] }
  0x24   : > { %s2307_s19 = sshll.u32 %s3002_s30, 3  ;;  %2495 = vmatprep.subr.mxu1 %v2844_v2  ;;  %v819_v38 = vld [vmem:[%s3441_s4 + $0x50] sm:$0xff]  ;;  %v820_v39 = vld [vmem:[%s3441_s4 + $0x58] sm:$0xff]  ;;  %v2319_v4 = vld [vmem:[%s3442_s5 + $0x1] ss:$0 sm:$0xff] }
  0x25   : > { %s591_s18 = scalar_lea.vmem %s3478_s0, %s2307_s19  ;;  %s598_s23 = scalar_lea.vmem %s3479_s20, %s2307_s19  ;;  %v2598_v40 = vpack.c.bf16 %v820_v39, %v819_v38 }
  0x26   : > { %v603_v6 = vld [vmem:[%s591_s18] sm:$0xff]  ;;  %s3200_s20 = sand.u32 1, %s2824_s25   ;;  %s2734_s18 = sshll.u32 %s2846_s29, 4  ;;  %s2735_s18 = int_to_ptr.vmem [resolvable:$false] %s2734_s18 }
  0x27   : > { %2427 = vmatprep.subr.msk.mxu0 %vm660_vm0, %v603_v6  ;;  %v3074_v25 = vld [vmem:[%s598_s23] sm:$0xff]  ;;  %s2306_s23 = sshll.u32 %s3200_s20, 5  ;;  %s2152_s19 = scalar_lea.sflag [#allocation7], %s3200_s20 }
  0x28   : > { %2428 = vmatpush3.xpose.msk.msra.mxu0 %vm660_vm0, %v603_v6  ;;  %2483 = vmatmul.mubr.msk.f32.vlgmr.msra.gmra.mrb[0].mxu1 %vm660_vm0, %v3074_v25  ;;  %v2321_v6 = vld [vmem:[%s3442_s5 + $0x3] ss:$0 sm:$0xff]  ;;  %s3205_s28 = scalar_lea.vmem [#allocation6], %s2306_s23  ;;  %s2354_s23 = sshll.u32 %s2832_s27, 9 }
  0x29   : > { %2582 = vmatprep.subr.bf16.mxu0 %v2842_v1  ;;  %2497 = vmatprep.mubr.msk.f32.mxu1 %vm2843_vm1, %v2844_v2  ;;  %s2180_s0 = sshll.u32 %s3205_s28, 4  ;;  %s3351_s24 = scalar_lea.hbm %s3454_s17, %s2354_s23  ;;  %s3346_s0 = int_to_ptr.vmem [resolvable:$true] %s2180_s0 }
  0x2a   : > { %s2730_s26 = scalar_lea.vmem %s3346_s0, 512  ;;  %p2737_p1 = scmp.lt.s32.totalorder %s3346_s0, %s2735_s18 }
  0x2b   : > { %2430 = vmatmul.mubr.msk.f32.vlgmr.msra.gmra.mrb[0].mxu0 %vm660_vm0, %v605_v7  ;;  %p2731_p12 = scmp.ne.s32.totalorder %s3346_s0, %s2730_s26 }
  0x2c   : > { %2584 = vmatpush3.bf16.msra.mxu0 %v2583_v11  ;;  %2432 = vmatprep.mubr.msk.f32.mxu0 %vm660_vm0, %v606_v8  ;;  %v2320_v11 = vld [vmem:[%s3442_s5 + $0x2] ss:$0 sm:$0xff] }
  0x2d   : > { %2585 = vmatprep.subr.bf16.mxu0 %v2842_v1  ;;  %p2732_p13 = pnand %p2731_p12, %p2980_p4 }
  0x2f   : > { %2433 = vmatmul.mubr.msk.f32.gmra.mrb[2].mxu0 %vm660_vm0, %v607_v22  ;;  %p2733_p0 = pneg %p2732_p13 }
  0x30   : > { %2435 = vmatprep.mubr.msk.f32.mxu0 %vm660_vm0, %v608_v24  ;;  %2587 = vmatpush3.bf16.msra.mxu0 %v2586_v23 }
  0x31   : > { %2588 = vmatprep.subr.bf16.mxu0 %v2842_v1 }
  0x33   : > { %2436 = vmatmul.mubr.msk.f32.gmra.mrb[4].mxu0 %vm660_vm0, %v609_v26 }
  0x34   : > { %2438 = vmatprep.mubr.msk.f32.mxu0 %vm660_vm0, %v610_v27 }
  0x37   : > { %2439 = vmatmul.mubr.msk.f32.gmra.mrb[6].mxu0 %vm660_vm0, %v611_v28  ;;  %v616_v28 = vld [vmem:[%s3440_s3 + $0x20] sm:$0xff] }
  0x38   : > { %2449 = vmatprep.mubr.msk.f32.mxu0 %vm2843_vm1, %v2844_v2 }
  0x3b   : > { %2450 = vmatmul.mubr.msk.f32.vlgmr.msra.gmra.mrb[8].mxu0 %vm660_vm0, %v3074_v25 }
  0x3c   : > { %2590 = vmatpush3.bf16.msra.mxu0 %v2589_v31  ;;  %2460 = vmatprep.mubr.msk.f32.mxu0 %vm2843_vm1, %v2844_v2 }
  0x3d   : > { %2591 = vmatprep.subr.bf16.mxu0 %v2842_v1 }
  0x40   : > { %2593 = vmatpush3.bf16.msra.mxu0 %v2592_v34 }
  0x41   : > { %2594 = vmatprep.subr.bf16.mxu0 %v2842_v1 }
  0x43   : > { %2461 = vmatmul.mubr.msk.f32.vlgmr.msra.gmra.mrb[10].mxu0 %vm660_vm0, %v3074_v25 }
  0x44   : > { %2596 = vmatpush3.bf16.msra.mxu0 %v2595_v37  ;;  %2471 = vmatprep.mubr.msk.f32.mxu0 %vm2843_vm1, %v2844_v2 }
  0x45   : > { %2597 = vmatprep.subr.bf16.mxu0 %v2842_v1 }
  0x48   : > { %2599 = vmatpush3.bf16.msra.mxu0 %v2598_v40 }
  0x49   : > { %2485 = vmatprep.subr.mxu0 %v2844_v2 }
  0x4b   : > { %2472 = vmatmul.mubr.msk.f32.vlgmr.msra.gmra.mrb[12].mxu0 %vm660_vm0, %v3074_v25 }
  0x4c   : > { %2487 = vmatprep.mubr.msk.f32.mxu0 %vm2843_vm1, %v2844_v2 }
  0x9d   : > { %v623_v41 = vpop.permute.xlu0 %622 }
  0x9e   : > { %v633_v42 = vpop.permute.xlu1 %632 }
  0xa1   : > { %v628_v43 = vpop.permute.xlu0 %627 }
  0xa2   : > { %v638_v48 = vpop.permute.xlu1 %637 }
  0xfb   : > { %v1133_v53 = vpop.f32.mrb[0].mxu1 }
  0xfc   : > { %v2484_v54 = vpop.f32.mrb[1].mxu1  ;;  %v1134_v10 = vadd.f32 %v2321_v6, %v1133_v53  ;;  %v619_v53 = vld [vmem:[%s3440_s3 + $0x38] sm:$0xff] }
  0xfe   : > { %v2431_v44 = vpop.f32.mrb[0].mxu0 }
  0xff   : > { %v760_v45 = vadd.f32 %v2431_v44, %v628_v43  ;;  %v754_v46 = vpop.f32.mrb[1].mxu0 }
 0x100   : > { %v755_v47 = vadd.f32 %v754_v46, %v623_v41 }
 0x101   : > { %797 = vst.msk [vmem:[#allocation2 + $0x8] sm:$0xff] %vm793_vm2, %v760_v45  ;;  %v618_v45 = vld [vmem:[%s3440_s3 + $0x30] sm:$0xff] }
 0x102   : > { %794 = vst.msk [vmem:[#allocation2] sm:$0xff] %vm793_vm2, %v755_v47  ;;  %v2434_v49 = vpop.f32.mrb[2].mxu0 }
 0x103   : > { %v770_v50 = vadd.f32 %v2434_v49, %v638_v48  ;;  %v764_v51 = vpop.f32.mrb[3].mxu0 }
 0x104   : > { %v765_v52 = vadd.f32 %v764_v51, %v633_v42 }
 0x105   : > { %805 = vst.msk [vmem:[#allocation2 + $0x18] sm:$0xff] %vm793_vm2, %v770_v50  ;;  %v617_v50 = vld [vmem:[%s3440_s3 + $0x28] sm:$0xff] }
 0x106   : > { %801 = vst.msk [vmem:[#allocation2 + $0x10] sm:$0xff] %vm793_vm2, %v765_v52  ;;  %v3140_v55 = vpop.f32.mrb[4].mxu0 }
 0x107   : > { %v3142_v56 = vpop.f32.mrb[5].mxu0 }
 0x108   : > { %v1138_v3 = vld [vmem:[#allocation2 + $0x8] sm:$0xff] }
 0x109   : > { %v1137_v57 = vld [vmem:[#allocation2] sm:$0xff] }
 0x10a   : > { %v3144_v58 = vpop.f32.mrb[6].mxu0  ;;  %2486 = vmatpush3.msra.mxu0 %v1137_v57 }
 0x10b   : > { %v3146_v59 = vpop.f32.mrb[7].mxu0  ;;  %2490 = vmatprep.subr.mxu0 %v2844_v2 }
 0x10c   : > { %v1140_v9 = vld [vmem:[#allocation2 + $0x18] sm:$0xff] }
 0x10d   : > { %v1139_v61 = vld [vmem:[#allocation2 + $0x10] sm:$0xff] }
 0x10e   : > { %v923_v62 = vpop.f32.mrb[8].mxu0  ;;  %2496 = vmatpush3.msra.mxu1 %v1139_v61 }
 0x10f   : > { %v924_v63 = vadd.f32 %v2318_v60, %v923_v62  ;;  %v2451_v0 = vpop.f32.mrb[9].mxu0  ;;  %2505 = vmatprep.subr.mxu1 %v2844_v2 }
 0x111   : > { %2488 = vmatmul.mubr.msk.f32.vlgmr.msra.gmra.mrb[14].mxu0 %vm793_vm2, %v924_v63 }
 0x112   : > { %2491 = vmatpush3.msra.mxu0 %v1138_v3  ;;  %2492 = vmatprep.mubr.msk.f32.mxu0 %vm2843_vm1, %v2844_v2 }
 0x113   : > { %2500 = vmatprep.subr.mxu0 %v2844_v2 }
 0x116   : > { %v993_v5 = vpop.f32.mrb[10].mxu0 }
 0x117   : > { %v994_v7 = vadd.f32 %v2319_v4, %v993_v5  ;;  %v2462_v8 = vpop.f32.mrb[11].mxu0 }
 0x119   : > { %2493 = vmatmul.mubr.msk.f32.vlgmr.msra.gmra.mrb[16].mxu0 %vm793_vm2, %v994_v7 }
 0x11a   : > { %2501 = vmatpush3.msra.mxu0 %v1140_v9  ;;  %2502 = vmatprep.mubr.msk.f32.mxu0 %vm2843_vm1, %v2844_v2 }
 0x11b   : > { %2510 = vmatprep.subr.mxu0 %v2844_v2 }
 0x11d   : > { %2503 = vmatmul.mubr.msk.f32.vlgmr.msra.gmra.mrb[18].mxu0 %vm793_vm2, %v1134_v10 }
 0x11e   : > { %v1063_v12 = vpop.f32.mrb[12].mxu0  ;;  %2512 = vmatprep.mubr.msk.f32.mxu0 %vm2843_vm1, %v2844_v2 }
 0x11f   : > { %v1064_v13 = vadd.f32 %v2320_v11, %v1063_v12  ;;  %v2473_v14 = vpop.f32.mrb[13].mxu0 }
 0x121   : > { %2498 = vmatmul.mubr.msk.f32.vlgmr.msra.gmra.mrb[2].mxu1 %vm793_vm2, %v1064_v13 }
 0x122   : > { %2507 = vmatprep.mubr.msk.f32.mxu1 %vm2843_vm1, %v2844_v2 }
 0x1e4   : > { %v1211_v15 = vpop.f32.mrb[14].mxu0 }
 0x1e5   : > { %v2489_v16 = vpop.f32.mrb[15].mxu0  ;;  %v1434_v17 = vsel %vm793_vm2, %v1211_v15, -inf }
 0x1e6   : > { %1435 = vmax.xlane.f32.xlu0 %v1434_v17  ;;  %v1824_v16 = vld [vmem:[%s3443_s6 + $0x10] sm:$0xff] }
 0x1ec   : > { %v1284_v18 = vpop.f32.mrb[16].mxu0 }
 0x1ed   : > { %v1437_v19 = vsel %vm793_vm2, %v1284_v18, -inf  ;;  %v2494_v20 = vpop.f32.mrb[17].mxu0 }
 0x1ee   : > { %1438 = vmax.xlane.f32.xlu1 %v1437_v19 }
 0x1f0   : > { %v1430_v21 = vpop.f32.mrb[18].mxu0 }
 0x1f1   : > { %v2504_v22 = vpop.f32.mrb[19].mxu0  ;;  %v1443_v27 = vsel %vm793_vm2, %v1430_v21, -inf }
 0x1f4   : > { %v1357_v23 = vpop.f32.mrb[2].mxu1 }
 0x1f5   : > { %v1440_v24 = vsel %vm793_vm2, %v1357_v23, -inf  ;;  %v2499_v26 = vpop.f32.mrb[3].mxu1 }
 0x1f6   : > { %1441 = vmax.xlane.f32.xlu0 %v1440_v24 }
 0x1fa   : > { %1444 = vmax.xlane.f32.xlu0 %v1443_v27 }
 0x1ff   : > { %642 = vperm.xlu1 %2709, %v616_v28  }
 0x273   : > { %v1436_v29 = vpop.xlane.xlu0 %1435 }
 0x274   : > { %v1446_v30 = vsub.f32 %v1211_v15, %v1436_v29  ;;  %v1823_v15 = vld [vmem:[%s3443_s6 + $0x8] sm:$0xff] }
 0x276   : > { %v1450_v31 = vmul.f32 1.442695, %v1446_v30  ;;  %v2338_v30 = vld [vmem:[%s3444_s7] ss:$0 sm:$0xff] }
 0x278   : > { %2710 = vpow2.f32 %v1450_v31 }
 0x27b   : > { %v1439_v32 = vpop.xlane.xlu1 %1438 }
 0x27c   : > { %v1447_v33 = vsub.f32 %v1284_v18, %v1439_v32  ;;  %v1825_v18 = vld [vmem:[%s3443_s6 + $0x18] sm:$0xff] }
 0x27d   : > { %v2610_v19 = vpack.c.bf16 %v1825_v18, %v1824_v16 }
 0x27e   : > { %v1452_v34 = vmul.f32 1.442695, %v1447_v33 }
 0x27f   : > { %v643_v35 = vpop.permute.xlu1 %642 }
 0x280   : > { %2712 = vpow2.f32 %v1452_v34  ;;  %v775_v36 = vadd.f32 %v3142_v56, %v643_v35 }
 0x282   : > { %v2711_v37 = vpop.eup %2710  ;;  %795 = vst.msk [vmem:[#allocation3] sm:$0xff] %vm793_vm2, %v775_v36 }
 0x283   : > { %v1442_v38 = vpop.xlane.xlu0 %1441  ;;  %v1458_v39 = vsel %vm793_vm2, %v2711_v37, 0.0 }
 0x284   : > { %1459 = vadd.xlane.f32.xlu1 %v1458_v39  ;;  %v1448_v48 = vsub.f32 %v1357_v23, %v1442_v38 }
 0x286   : > { %v1454_v49 = vmul.f32 1.442695, %v1448_v48 }
 0x287   : > { %v1445_v40 = vpop.xlane.xlu0 %1444 }
 0x288   : > { %v1449_v41 = vsub.f32 %v1430_v21, %v1445_v40 }
 0x28a   : > { %v2713_v42 = vpop.eup %2712  ;;  %v1456_v43 = vmul.f32 1.442695, %v1449_v41  ;;  %v1938_v41 = vld [vmem:[%s3447_s10 + $0x8] sm:$0xff] }
 0x28b   : > { %v1461_v44 = vsel %vm793_vm2, %v2713_v42, 0.0 }
 0x28c   : > { %2714 = vpow2.f32 %v1456_v43  ;;  %1462 = vadd.xlane.f32.xlu0 %v1461_v44  ;;  %v1940_v43 = vld [vmem:[%s3447_s10 + $0x18] sm:$0xff] }
 0x28d   : > { %2716 = vpow2.f32 %v1454_v49  ;;  %v2025_v49 = vld [vmem:[%s3449_s12 + $0x18] sm:$0xff] }
 0x295   : > { %652 = vperm.xlu1 %2709, %v618_v45   ;;  %v2022_v45 = vld [vmem:[%s3449_s12] sm:$0xff] }
 0x296   : > { %v2715_v46 = vpop.eup %2714 }
 0x297   : > { %v1467_v47 = vsel %vm793_vm2, %v2715_v46, 0.0  ;;  %v2717_v51 = vpop.eup %2716 }
 0x298   : > { %1468 = vadd.xlane.f32.xlu0 %v1467_v47  ;;  %v1464_v52 = vsel %vm793_vm2, %v2717_v51, 0.0  ;;  %v2024_v47 = vld [vmem:[%s3449_s12 + $0x10] sm:$0xff] }
 0x2ae   : > { %647 = vperm.xlu0 %2708, %v617_v50   ;;  %v2622_v50 = vpack.c.bf16 %v2025_v49, %v2024_v47 }
 0x2b9   : > { %1465 = vadd.xlane.f32.xlu1 %v1464_v52  ;;  %v2027_v52 = vld [vmem:[%s3449_s12 + $0x28] sm:$0xff] }
 0x2ca   : > { %657 = vperm.xlu1 %2709, %v619_v53  }
 0x311   : > { %v1460_v54 = vpop.xlane.xlu1 %1459 }
 0x312   : > { %2718 = vrcp.f32 %v1460_v54  ;;  %v2028_v54 = vld [vmem:[%s3449_s12 + $0x30] sm:$0xff] }
 0x315   : > { %v653_v56 = vpop.permute.xlu1 %652 }
 0x316   : > { %v785_v57 = vadd.f32 %v3146_v59, %v653_v56  ;;  %v1482_v59 = vld [vmem:[#allocation3] sm:$0xff]  ;;  %v2029_v56 = vld [vmem:[%s3449_s12 + $0x38] sm:$0xff] }
 0x318   : > { %803 = vst.msk [vmem:[#allocation3 + $0x10] sm:$0xff] %vm793_vm2, %v785_v57  ;;  %v2628_v57 = vpack.c.bf16 %v2029_v56, %v2028_v54 }
 0x319   : > { %v1463_v60 = vpop.xlane.xlu0 %1462 }
 0x31a   : > { %2720 = vrcp.f32 %v1463_v60  ;;  %v2030_v60 = vld [vmem:[%s3449_s12 + $0x40] sm:$0xff] }
 0x31c   : > { %v2719_v61 = vpop.eup %2718 }
 0x31d   : > { %v1471_v62 = vmul.f32 %v2719_v61, %v2711_v37  ;;  %v2031_v61 = vld [vmem:[%s3449_s12 + $0x48] sm:$0xff] }
 0x31f   : > { %2506 = vmatpush3.xpose.msk.msra.mxu1 %vm793_vm2, %v1471_v62  ;;  %1478 = vst.msk [vmem:[%s3205_s28] sm:$0xff] %vm793_vm2, %v1471_v62  ;;  %v1484_v14 = vld [vmem:[#allocation3 + $0x10] sm:$0xff]  ;;  %v2631_v62 = vpack.c.bf16 %v2031_v61, %v2030_v60 }
 0x320   : > { %2515 = vmatprep.subr.mxu1 %v2844_v2 }
 0x322   : > { %2508 = vmatmul.mubr.msk.f32.vlgmr.msra.gmra.mrb[4].mxu1 %vm793_vm2, %v1482_v59  ;;  %v2032_v59 = vld [vmem:[%s3449_s12 + $0x50] sm:$0xff] }
 0x323   : > { %2517 = vmatprep.mubr.msk.f32.mxu1 %vm2843_vm1, %v2844_v2 }
 0x324   : > { %v2721_v63 = vpop.eup %2720 }
 0x325   : > { %v1473_v0 = vmul.f32 %v2721_v63, %v2713_v42  ;;  %v1469_v3 = vpop.xlane.xlu0 %1468  ;;  %v2033_v63 = vld [vmem:[%s3449_s12 + $0x58] sm:$0xff] }
 0x326   : > { %2722 = vrcp.f32 %v1469_v3  ;;  %v2034_v3 = vld [vmem:[%s3449_s12 + $0x60] sm:$0xff] }
 0x327   : > { %2511 = vmatpush3.xpose.msk.msra.mxu0 %vm793_vm2, %v1473_v0  ;;  %1479 = vst.msk [vmem:[%s3205_s28 + $0x8] sm:$0xff] %vm793_vm2, %v1473_v0  ;;  %v2634_v0 = vpack.c.bf16 %v2033_v63, %v2032_v59 }
 0x328   : > { %2520 = vmatprep.subr.mxu0 %v2844_v2 }
 0x32d   : > { %v648_v4 = vpop.permute.xlu0 %647 }
 0x32e   : > { %v780_v5 = vadd.f32 %v3140_v55, %v648_v4  ;;  %v2035_v4 = vld [vmem:[%s3449_s12 + $0x68] sm:$0xff] }
 0x330   : > { %v2723_v6 = vpop.eup %2722  ;;  %799 = vst.msk [vmem:[#allocation3 + $0x8] sm:$0xff] %vm793_vm2, %v780_v5  ;;  %v2637_v5 = vpack.c.bf16 %v2035_v4, %v2034_v3 }
 0x331   : > { %v1477_v7 = vmul.f32 %v2723_v6, %v2715_v46  ;;  %v2023_v46 = vld [vmem:[%s3449_s12 + $0x8] sm:$0xff] }
 0x332   : > { %v2619_v48 = vpack.c.bf16 %v2023_v46, %v2022_v45 }
 0x333   : > { %1481 = vst.msk [vmem:[%s3205_s28 + $0x18] sm:$0xff] %vm793_vm2, %v1477_v7 }
 0x337   : > { %v1483_v8 = vld [vmem:[#allocation3 + $0x8] sm:$0xff] }
 0x338   : > { %2513 = vmatmul.mubr.msk.f32.vlgmr.msra.gmra.mrb[20].mxu0 %vm793_vm2, %v1483_v8 }
 0x339   : > { %2521 = vmatpush3.xpose.msk.msra.mxu0 %vm793_vm2, %v1477_v7  ;;  %2522 = vmatprep.mubr.msk.f32.mxu0 %vm2843_vm1, %v2844_v2 }
 0x33a   : > { %2612 = vmatprep.subr.bf16.mxu0 %v2842_v1 }
 0x346   : > { %v1466_v9 = vpop.xlane.xlu1 %1465 }
 0x347   : > { %2724 = vrcp.f32 %v1466_v9 }
 0x34a   : > { %v658_v55 = vpop.permute.xlu1 %657 }
 0x34b   : > { %v790_v10 = vadd.f32 %v3144_v58, %v658_v55  ;;  %v1822_v58 = vld [vmem:[%s3443_s6] sm:$0xff] }
 0x34c   : > { %v2607_v17 = vpack.c.bf16 %v1823_v15, %v1822_v58  ;;  %v2340_v55 = vld [vmem:[%s3445_s8] ss:$0 sm:$0xff] }
 0x34d   : > { %807 = vst.msk [vmem:[#allocation3 + $0x18] sm:$0xff] %vm793_vm2, %v790_v10  ;;  %v2342_v15 = vld [vmem:[%s3448_s11] ss:$0 sm:$0xff] }
 0x351   : > { %v2725_v11 = vpop.eup %2724 }
 0x352   : > { %v1475_v12 = vmul.f32 %v2725_v11, %v2717_v51  ;;  %v2026_v51 = vld [vmem:[%s3449_s12 + $0x20] sm:$0xff] }
 0x353   : > { %v2625_v53 = vpack.c.bf16 %v2027_v52, %v2026_v51  ;;  %v2341_v11 = vld [vmem:[%s3446_s9] ss:$0 sm:$0xff] }
 0x354   : > { %2516 = vmatpush3.xpose.msk.msra.mxu1 %vm793_vm2, %v1475_v12  ;;  %v1485_v13 = vld [vmem:[#allocation3 + $0x18] sm:$0xff]  ;;  %1480 = vst.msk [vmem:[%s3205_s28 + $0x10] sm:$0xff] %vm793_vm2, %v1475_v12  ;;  %s2736_s28 = scalar_lea.vmem %s2735_s18, 1024 }
 0x355   : > { %2523 = vmatmul.mubr.msk.f32.vlgmr.msra.gmra.mrb[22].mxu0 %vm793_vm2, %v1485_v13  ;;  %2606 = vmatprep.subr.bf16.mxu1 %v2842_v1  ;;  %p2738_p2 = scmp.lt.s32.totalorder %s2736_s28, %s2730_s26 }
 0x356   : > { %2544 = vmatprep.mubr.msk.f32.mxu0 %vm2843_vm1, %v2844_v2 }
 0x357   : > { %2518 = vmatmul.mubr.msk.f32.vlgmr.msra.gmra.mrb[6].mxu1 %vm793_vm2, %v1484_v14  ;;  %v2037_v14 = vld [vmem:[%s3449_s12 + $0x78] sm:$0xff]  ;;  %p2739_p3 = por %p2738_p2, %p2737_p1 }
 0x358   : > { %2533 = vmatprep.mubr.msk.f32.mxu1 %vm2843_vm1, %v2844_v2  ;;  %2608 = vmatpush3.bf16.msra.mxu1 %v2607_v17 }
 0x359   : > { %2609 = vmatprep.subr.bf16.mxu1 %v2842_v1  ;;  %p2740_p5 = pnand %p2739_p3, %p2733_p0 }
 0x35c   : > { %2611 = vmatpush3.bf16.msra.mxu1 %v2610_v19 }
 0x35d   : > { %2618 = vmatprep.subr.bf16.mxu1 %v2842_v1 }
 0x3f5   : > { %v1558_v20 = vpop.f32.mrb[4].mxu1 }
 0x3f6   : > { %v2509_v21 = vpop.f32.mrb[5].mxu1  ;;  %1790 = vxpose.xlu0.b32.start [1/4] (short) (narrow) %v1558_v20, 8  ;;  %v2344_v20 = vld [vmem:[%s3450_s13] ss:$0 sm:$0xff] }
 0x40b   : > { %v1634_v22 = vpop.f32.mrb[20].mxu0 }
 0x40c   : > { %1791 = vxpose.xlu0.b32.cont [2/4] (short) (narrow) %v1634_v22, 8  ;;  %v2514_v23 = vpop.f32.mrb[21].mxu0 }
 0x428   : > { %v1786_v24 = vpop.f32.mrb[22].mxu0 }
 0x429   : > { %v2524_v26 = vpop.f32.mrb[23].mxu0 }
 0x42a   : > { %v1710_v27 = vpop.f32.mrb[6].mxu1 }
 0x42b   : > { %v2519_v28 = vpop.f32.mrb[7].mxu1  ;;  %1792 = vxpose.xlu0.b32.cont [3/4] (short) (narrow) %v1710_v27, 8 }
 0x42f   : > { %1793 = vxpose.xlu0.b32.end [4/4] (short) (narrow) %v1786_v24, 8 }
 0x4a3   : > { %v1806_v29 = vpop.trf.xlu0 }
 0x4a4   : > { %2534 = vmatmul.mubr.msk.f32.vlgmr.msra.gmra.mrb[8].mxu1 %vm660_vm0, %v1806_v29 }
 0x4a5   : > { %2579 = vmatprep.mubr.msk.f32.mxu1 %vm2843_vm1, %v2844_v2  ;;  %v1937_v2 = vld [vmem:[%s3447_s10] sm:$0xff]  ;;  %2620 = vmatpush3.bf16.msra.mxu1 %v2619_v48 }
 0x4a6   : > { %v2613_v42 = vpack.c.bf16 %v1938_v41, %v1937_v2  ;;  %2621 = vmatprep.subr.bf16.mxu1 %v2842_v1 }
 0x4a8   : > { %2614 = vmatpush3.bf16.msra.mxu0 %v2613_v42 }
 0x4a9   : > { %2615 = vmatprep.subr.bf16.mxu0 %v2842_v1  ;;  %2623 = vmatpush3.bf16.msra.mxu1 %v2622_v50 }
 0x4aa   : > { %2624 = vmatprep.subr.bf16.mxu1 %v2842_v1 }
 0x4ad   : > { %2626 = vmatpush3.bf16.msra.mxu1 %v2625_v53 }
 0x4ae   : > { %2627 = vmatprep.subr.bf16.mxu1 %v2842_v1 }
 0x4b1   : > { %2629 = vmatpush3.bf16.msra.mxu1 %v2628_v57 }
 0x4b2   : > { %2630 = vmatprep.subr.bf16.mxu1 %v2842_v1 }
 0x4b5   : > { %2632 = vmatpush3.bf16.msra.mxu1 %v2631_v62 }
 0x4b6   : > { %2633 = vmatprep.subr.bf16.mxu1 %v2842_v1 }
 0x4b9   : > { %2635 = vmatpush3.bf16.msra.mxu1 %v2634_v0 }
 0x4ba   : > { %2636 = vmatprep.subr.bf16.mxu1 %v2842_v1 }
 0x4bd   : > { %2638 = vmatpush3.bf16.msra.mxu1 %v2637_v5 }
 0x4be   : > { %2639 = vmatprep.subr.bf16.mxu1 %v2842_v1  ;;  %v2036_v1 = vld [vmem:[%s3449_s12 + $0x70] sm:$0xff] }
 0x4bf   : > { %v2640_v58 = vpack.c.bf16 %v2037_v14, %v2036_v1 }
 0x4c1   : > { %2641 = vmatpush3.bf16.msra.mxu1 %v2640_v58 }
 0x577   : > { %v1902_v31 = vpop.f32.mrb[8].mxu1 }
 0x578   : > { %v1903_v32 = vadd.f32 %v2338_v30, %v1902_v31  ;;  %v2535_v33 = vpop.f32.mrb[9].mxu1 }
 0x57a   : > { %v1906_v34 = vadd.f32 %v1903_v32, %v3074_v25  ;;  %v1939_v25 = vld [vmem:[%s3447_s10 + $0x10] sm:$0xff] }
 0x57b   : > { %v2616_v44 = vpack.c.bf16 %v1940_v43, %v1939_v25 }
 0x57c   : > { %v1909_v35 = vsel %vm660_vm0, %v1906_v34, 0.0 }
 0x57d   : > { %1910 = vadd.xlane.f32.xlu1 %v1909_v35  ;;  %2617 = vmatpush3.bf16.msra.mxu0 %v2616_v44 }
 0x60a   : > { %v1911_v36 = vpop.xlane.xlu1 %1910 }
 0x60b   : > { %v1913_v37 = vmul.f32 0.03125, %v1911_v36 }
 0x60d   : > { %v1914_v38 = vsub.f32 %v1906_v34, %v1913_v37 }
 0x60f   : > { %v1915_v39 = vmul.f32 %v1914_v38, %v1914_v38 }
 0x611   : > { %v1916_v40 = vsel %vm660_vm0, %v1915_v39, 0.0 }
 0x612   : > { %1917 = vadd.xlane.f32.xlu1 %v1916_v40 }
 0x69f   : > { %v1918_v6 = vpop.xlane.xlu1 %1917 }
 0x6a0   : > { %v1919_v7 = vmul.f32 0.03125, %v1918_v6 }
 0x6a2   : > { %v1920_v8 = vadd.f32 1e-05, %v1919_v7 }
 0x6a4   : > { %2726 = vrsqrt.f32 %v1920_v8 }
 0x6ae   : > { %v2727_v9 = vpop.eup %2726 }
 0x6af   : > { %v1922_v10 = vmul.f32 %v2727_v9, %v1914_v38 }
 0x6b1   : > { %v1929_v12 = vmul.f32 %v2340_v55, %v1922_v10 }
 0x6b3   : > { %v1936_v13 = vadd.f32 %v2341_v11, %v1929_v12 }
 0x6b5   : > { %2545 = vmatmul.mubr.msk.f32.vlgmr.msra.gmra.mrb[24].mxu0 %vm660_vm0, %v1936_v13 }
 0x788   : > { %v2017_v16 = vpop.f32.mrb[24].mxu0 }
 0x789   : > { %v2018_v17 = vadd.f32 %v2342_v15, %v2017_v16  ;;  %v2546_v18 = vpop.f32.mrb[25].mxu0 }
 0x78b   : > { %v2021_v19 = vmax.f32 %v2018_v17, 0.0 }
 0x78d   : > { %2580 = vmatmul.mubr.f32.vlgmr.msra.gmra.mrb[10].mxu1 %v2021_v19 }
 0x860   : > { %v2111_v21 = vpop.f32.mrb[10].mxu1 }
 0x861   : > { %v2112_v22 = vadd.f32 %v2344_v20, %v2111_v21  ;;  %v2581_v23 = vpop.f32.mrb[11].mxu1 }
 0x863   : > { %v2115_v24 = vadd.f32 %v2112_v22, %v1936_v13 }
 0x865   : > { %v2118_v26 = vsel %vm660_vm0, %v2115_v24, 0.0 }
 0x866   : > { %2119 = vadd.xlane.f32.xlu1 %v2118_v26 }
 0x8f3   : > { %v2120_v27 = vpop.xlane.xlu1 %2119 }
 0x8f4   : > { %v2121_v28 = vmul.f32 0.03125, %v2120_v27 }
 0x8f6   : > { %v2122_v29 = vsub.f32 %v2115_v24, %v2121_v28 }
 0x8f8   : > { %v2123_v30 = vmul.f32 %v2122_v29, %v2122_v29 }
 0x8fa   : > { %v2124_v31 = vsel %vm660_vm0, %v2123_v30, 0.0 }
 0x8fb   : > { %2125 = vadd.xlane.f32.xlu0 %v2124_v31 }
 0x8fc   : > { %2743 = shalt.err (!%p2740_p5)
}
 0x8fd   : > { %s2744_s15 = scalar_lea.hbm %s3351_s24, 512  ;;  %s2748_s23 = scalar_lea.hbm %s3454_s17, 1024 }
 0x8fe   : > { %p2745_p6 = scmp.ne.s32.totalorder %s3351_s24, %s2744_s15  ;;  %p2749_p10 = scmp.lt.u32.totalorder %s3351_s24, %s3454_s17 }
 0x8ff   : > { %p2750_p11 = scmp.lt.u32.totalorder %s2748_s23, %s2744_s15  ;;  %p2752_p13 = scmp.lt.u32.totalorder %s2744_s15, %s3351_s24 }
 0x900   : > { %p2746_p7 = pnand %p2745_p6, %p2980_p4 }
 0x901   : > { %p2751_p12 = por %p2750_p11, %p2749_p10 }
 0x902   : > { %p2747_p9 = pneg %p2746_p7 }
 0x903   : > { %p2753_p0 = por %p2752_p13, %p2751_p12 }
 0x905   : > { %p2754_p1 = pnand %p2753_p0, %p2747_p9 }
 0x907   : > { %2757 = shalt.err (!%p2754_p1)
}
 0x908   : > { %s2847_s26 = smov 128   ;;  %s2848_s29 = smov 8   ;;  %v2345_v36 = vld [vmem:[%s3451_s14] ss:$0 sm:$0xff] }
 0x909   : > { %2643 = dma.vmem_to_hbm [thread:$0]  (%p2980_p4), %s3346_s0, 512, %s3351_s24, %s2152_s19, %s2847_s26, %s2847_s26, %s2848_s29  }
 0x90a   : > { %s2305_s18 = sshll.u32 %s3200_s20, 3  ;;  %s3480_s23 = sld [smem:[#allocation20_spill]] }
 0x90b   : > { %s2349_s22 = sshll.u32 %s2832_s27, 7  ;;  %s580_s30 = scalar_lea.vmem [#allocation4], %s2305_s18 }
 0x90c   : > { %s2166_s0 = sshll.u32 %s580_s30, 4  ;;  %s3481_s26 = sld [smem:[#allocation21_spill]]  ;;  %s3390_s0 = int_to_ptr.vmem [resolvable:$true] %s2166_s0 }
 0x90d   : > { %s2147_s28 = scalar_lea.sflag [#allocation5], %s3200_s20  ;;  %s2758_s15 = scalar_lea.vmem %s3390_s0, 128 }
 0x90e   : > { %p2759_p2 = scmp.ne.s32.totalorder %s3390_s0, %s2758_s15  ;;  %s2849_s27 = smov [#allocation4]  }
 0x90f   : > { %s2762_s18 = sshll.u32 %s2849_s27, 4  ;;  %s2763_s18 = int_to_ptr.vmem [resolvable:$false] %s2762_s18 }
 0x910   : > { %v2346_v38 = vld [vmem:[%s3480_s23] ss:$0 sm:$0xff]  ;;  %p2760_p3 = pnand %p2759_p2, %p2980_p4  ;;  %s2764_s16 = scalar_lea.vmem %s2763_s18, 256 }
 0x911   : > { %p2765_p6 = scmp.lt.s32.totalorder %s3390_s0, %s2763_s18  ;;  %p2766_p7 = scmp.lt.s32.totalorder %s2764_s16, %s2758_s15 }
 0x912   : > { %s3482_s2 = smov %s3481_s26  ;;  %s3388_s29 = scalar_lea.hbm %s3481_s26, %s2349_s22 }
 0x913   : > { %p2761_p5 = pneg %p2760_p3  ;;  %p2767_p9 = por %p2766_p7, %p2765_p6 }
 0x915   : > { %p2768_p10 = pnand %p2767_p9, %p2761_p5 }
 0x988   : > { %v2126_v32 = vpop.xlane.xlu0 %2125 }
 0x989   : > { %v2127_v33 = vmul.f32 0.03125, %v2126_v32 }
 0x98b   : > { %v2128_v34 = vadd.f32 1e-05, %v2127_v33 }
 0x98d   : > { %2728 = vrsqrt.f32 %v2128_v34 }
 0x997   : > { %v2729_v35 = vpop.eup %2728 }
 0x998   : > { %v2130_v37 = vmul.f32 %v2729_v35, %v2122_v29 }
 0x99a   : > { %v2137_v39 = vmul.f32 %v2345_v36, %v2130_v37 }
 0x99c   : > { %v2144_v40 = vadd.f32 %v2346_v38, %v2137_v39 }
 0x99e   : > { %2145 = vst.msk [vmem:[%s580_s30] sm:$0xff] %vm660_vm0, %v2144_v40 }
 0x99f   : > { %2771 = shalt.err (!%p2768_p10)
}
 0x9a0   : > { %s2772_s20 = scalar_lea.hbm %s3388_s29, 128  ;;  %s2776_s22 = scalar_lea.hbm %s3482_s2, 256 }
 0x9a1   : > { %p2773_p11 = scmp.ne.s32.totalorder %s3388_s29, %s2772_s20  ;;  %p2777_p0 = scmp.lt.u32.totalorder %s3388_s29, %s3482_s2 }
 0x9a2   : > { %p2778_p1 = scmp.lt.u32.totalorder %s2776_s22, %s2772_s20  ;;  %p2780_p3 = scmp.lt.u32.totalorder %s2772_s20, %s3388_s29 }
 0x9a3   : > { %p2774_p12 = pnand %p2773_p11, %p2980_p4 }
 0x9a4   : > { %p2779_p2 = por %p2778_p1, %p2777_p0 }
 0x9a5   : > { %p2775_p13 = pneg %p2774_p12 }
 0x9a6   : > { %p2781_p5 = por %p2780_p3, %p2779_p2 }
 0x9a8   : > { %p2782_p6 = pnand %p2781_p5, %p2775_p13 }
 0x9aa   : > { %2785 = shalt.err (!%p2782_p6)
}
 0x9ab   : > { %2642 = dma.vmem_to_hbm [thread:$0]  (%p2980_p4), %s3390_s0, 128, %s3388_s29, %s2147_s28  }
 0x9ac PF: > { %s3483_s19 = sld [smem:[#allocation13_spill]]  ;;  %s3484_s26 = sld [smem:[#allocation10_spill]] }
 0x9b2   : > { %p2653_p7 = scmp.ge.s32.totalorder %s3483_s19, 2  ;;  %s2195_s27 = sand.u32 1, %s3484_s26  }
 0x9b3   : > { %s2196_s18 = scalar_lea.sflag [#allocation5], %s2195_s27 }
 0x9b4   : > { %p2647_p9 = pnand %p2653_p7, %p2987_p8 }
 0x9b6   : > { %2811 = dma.done.wait (!%p2647_p9), %s2196_s18, 128  }
 0x9b7   : > { %2813 = vsyncadd (!%p2647_p9), %s2196_s18, 4294967168  ;;  %s2205_s16 = scalar_lea.sflag [#allocation7], %s2195_s27 }
 0x9b8   : > { %2815 = dma.done.wait (!%p2647_p9), %s2205_s16, 512  }
 0x9b9   : > { %2817 = vsyncadd (!%p2647_p9), %s2205_s16, 4294966784  ;;  %s34_s29 = sadd.s32 1, %s3483_s19   ;;  %s3486_s1 = sld [smem:[#allocation11_spill]] }
 0x9ba   : > { %p31_p10 = scmp.ge.s32.totalorder %s34_s29, 4   ;;  %s3487_s26 = sld [smem:[#allocation16_spill]] }
 0x9bb   : > { %s3488_s27 = sld [smem:[#allocation12_spill]]  ;;  %s3489_s28 = sld [smem:[#allocation14_spill]] }
 0x9bc   : > { %s3490_s24 = smov %s2824_s25  ;;  %33 = sbr.rel (!%p31_p10) target bundleno = 12 (0xc), region = 149 }
 0x9bf   : > { %s3491_s25 = smov %s3486_s1 }
 0x9c3   :  { %2210 = vsyncpa [#allocation5], 1 }
 0x9c4   :  { %2212 = vsyncpa [#allocation5 + $0x1], 1 }
 0x9c5   :  { %2213 = vsyncpa [#allocation7], 1 }
 0x9c6   :  { %2215 = vsyncpa [#allocation7 + $0x1], 1 }

</bundles_post_ra>
